<compile_context>
chip_gen: v5e
topology: v5e:2x2
jax: 0.10.0
libtpu: 0.0.40
codegen_flags: <defaults>
</compile_context>

<pallas_src>
import numpy as np
import jax
import jax.numpy as jnp
from jax.experimental import pallas as pl
from jax.experimental.pallas import tpu as pltpu


def _round_up(x: int, m: int) -> int:
    return ((x + m - 1) // m) * m


# ---------------------------------------------------------------------------
# Fused forward kernel (one batch tile per grid step; weights resident in VMEM)
# ---------------------------------------------------------------------------
def _ae_fused_kernel(x_ref, w1_ref, b1_ref, w2_ref, b2_ref, w3_ref, b3_ref,
                     w4_ref, b4_ref, out_ref, h_scr):
    f32 = jnp.float32
    bf16 = w1_ref.dtype
    TB, n_inst, _ = x_ref.shape
    Hp = w1_ref.shape[1]

    w1 = w1_ref[...]                                          # (D, Hp)  bf16
    w4 = w4_ref[...]                                          # (Hp, D)  bf16
    # Hoist bias broadcasts out of the instance loops (JAX does not CSE broadcast_in_dim).
    b1 = jnp.broadcast_to(b1_ref[...], (TB, Hp))              # (TB, Hp) f32
    b4 = jnp.broadcast_to(b4_ref[...], (TB, w4.shape[1]))     # (TB, D)  f32

    # ---- Encoder layer 1: Linear(D -> H) + ReLU, per instance.  bf16 results are stored
    #      into 128-aligned lane slices of a (TB, I*Hp) scratch: that store IS the Flatten
    #      (pure index arithmetic) and feeds layer 2 as one big-K matmul.
    for i in range(n_inst):
        xi = x_ref[:, i, :].astype(bf16)                                     # (TB, D)
        h1 = jnp.maximum(jnp.dot(xi, w1, preferred_element_type=f32) + b1, 0.0)
        h_scr[:, i * Hp:(i + 1) * Hp] = h1.astype(bf16)

    # ---- Encoder layer 2: Linear(I*H -> E) + ReLU as ONE (TB, I*Hp) x (I*Hp, Ep) matmul.
    #      (The decoder's leading ReLU is a no-op on a ReLU output and is folded away.)
    h2 = jnp.dot(h_scr[...], w2_ref[...], preferred_element_type=f32) + b2_ref[...]
    h2 = jnp.maximum(h2, 0.0).astype(bf16)                    # (TB, Ep)

    # ---- Decoder layer 1: Linear(E -> I*H) + ReLU as ONE (TB, Ep) x (Ep, I*Hp) matmul.
    h3 = jnp.dot(h2, w3_ref[...], preferred_element_type=f32) + b3_ref[...]
    h3 = jnp.maximum(h3, 0.0).astype(bf16)                    # (TB, I*Hp)

    # ---- Decoder layer 2: Unflatten + Linear(H -> D), per instance; each instance uses a
    #      128-aligned lane slice of h3 and writes straight into the (TB, I, D) out block.
    for i in range(n_inst):
        h3i = h3[:, i * Hp:(i + 1) * Hp]                                     # (TB, Hp)
        yi = jnp.dot(h3i, w4, preferred_element_type=f32) + b4               # (TB, D)
        out_ref[:, i, :] = yi.astype(out_ref.dtype)


# ---------------------------------------------------------------------------
# One-time weight preparation (hoisted out of the per-call forward; cache the result)
# ---------------------------------------------------------------------------
def prepare_ae_params(params):
    """Pad / transpose PyTorch-layout (out_features, in_features) AE params into the
    kernel layout: lane-padded bf16 weights, f32 biases.  Call ONCE at model setup."""
    W1, b1, W2, b2, W3, b3, W4, b4 = params
    H, D = int(W1.shape[0]), int(W1.shape[1])
    E = int(W2.shape[0])
    I = int(W2.shape[1]) // H
    assert W2.shape == (E, I * H) and W3.shape == (I * H, E) and W4.shape == (D, H)
    Hp, Ep = _round_up(H, 128), _round_up(E, 128)
    bf16, f32 = jnp.bfloat16, jnp.float32

    w1p = jnp.zeros((D, Hp), bf16).at[:, :H].set(W1.T.astype(bf16))
    b1p = jnp.zeros((1, Hp), f32).at[0, :H].set(b1.astype(f32))
    w2p = jnp.zeros((I, Hp, Ep), bf16).at[:, :H, :E].set(
        W2.T.reshape(I, H, E).astype(bf16)).reshape(I * Hp, Ep)
    b2p = jnp.zeros((1, Ep), f32).at[0, :E].set(b2.astype(f32))
    w3p = jnp.zeros((Ep, I, Hp), bf16).at[:E, :, :H].set(
        W3.T.reshape(E, I, H).astype(bf16)).reshape(Ep, I * Hp)
    b3p = jnp.zeros((I, Hp), f32).at[:, :H].set(
        b3.reshape(I, H).astype(f32)).reshape(1, I * Hp)
    w4p = jnp.zeros((Hp, D), bf16).at[:H, :].set(W4.T.astype(bf16))
    b4p = b4.astype(f32).reshape(1, D)
    return (w1p, b1p, w2p, b2p, w3p, b3p, w4p, b4p)


# ---------------------------------------------------------------------------
# Forward wrapper
# ---------------------------------------------------------------------------
def ae_forward_pallas(x, prepared_params, *, batch_tile=None):
    """AE.forward for the default config.  x: (B, n_instance, n_dim).
    Returns a bf16 (B, n_instance, n_dim) reconstruction."""
    w1p, b1p, w2p, b2p, w3p, b3p, w4p, b4p = prepared_params
    B, I, D = x.shape
    Hp = w1p.shape[1]
    Ep = w2p.shape[1]
    IHp = w2p.shape[0]
    assert IHp == I * Hp and w1p.shape[0] == D and w4p.shape == (Hp, D)

    # Batch tile: large enough to amortize per-grid-step overhead / fill the MXU M dim,
    # but always >= 2 grid steps when the batch allows it (v7x has 2 TensorCores).
    if batch_tile is None:
        batch_tile = min(512, B)
        if B > 1 and -(-B // batch_tile) < 2:
            batch_tile = -(-B // 2)
    TB = max(1, int(batch_tile))
    Bp = _round_up(B, TB)
    if Bp != B:
        x = jnp.pad(x, ((0, Bp - B), (0, 0), (0, 0)))          # batch pad only (cheap)

    # VMEM budget from the real footprint (default pipeliner double-buffers every input,
    # including the constant-index weights, plus the output block and scratch/intermediates).
    x_item = jnp.dtype(x.dtype).itemsize
    weight_bytes = sum(int(np.prod(a.shape)) * jnp.dtype(a.dtype).itemsize
                       for a in prepared_params)
    act_bytes = 2 * TB * I * D * x_item + 2 * TB * I * D * 2
    scratch_bytes = TB * IHp * 2
    interm_bytes = TB * IHp * 6 + TB * Ep * 8 + TB * Hp * 8
    vmem_needed = 2 * weight_bytes + act_bytes + scratch_bytes + interm_bytes
    vmem_limit = int(min(max(2 * vmem_needed, 32 * 1024 * 1024), 100 * 1024 * 1024))

    out = pl.pallas_call(
        _ae_fused_kernel,
        out_shape=jax.ShapeDtypeStruct((Bp, I, D), jnp.bfloat16),
        grid_spec=pltpu.PrefetchScalarGridSpec(
            num_scalar_prefetch=0,
            grid=(Bp // TB,),
            in_specs=[
                pl.BlockSpec((TB, I, D), lambda b: (b, 0, 0)),   # activations: streamed
                pl.BlockSpec((D, Hp), lambda b: (0, 0)),         # weights: VMEM-resident
                pl.BlockSpec((1, Hp), lambda b: (0, 0)),
                pl.BlockSpec((IHp, Ep), lambda b: (0, 0)),       # flattened, 2-D
                pl.BlockSpec((1, Ep), lambda b: (0, 0)),
                pl.BlockSpec((Ep, IHp), lambda b: (0, 0)),       # flattened, 2-D
                pl.BlockSpec((1, IHp), lambda b: (0, 0)),
                pl.BlockSpec((Hp, D), lambda b: (0, 0)),
                pl.BlockSpec((1, D), lambda b: (0, 0)),
            ],
            out_specs=pl.BlockSpec((TB, I, D), lambda b: (b, 0, 0)),
            scratch_shapes=[pltpu.VMEM((TB, IHp), jnp.bfloat16)],  # flattened h1 slab
        ),
        compiler_params=pltpu.CompilerParams(
            dimension_semantics=("parallel",),    # batch axis -> megacore / 2 TCs on v7x
            vmem_limit_bytes=vmem_limit,
        ),
    )(x, w1p, b1p, w2p, b2p, w3p, b3p, w4p, b4p)

    return out[:B]


# ---------------------------------------------------------------------------
# Pure-JAX reference (mirrors the PyTorch module; same bf16-in / f32-accumulate math)
# ---------------------------------------------------------------------------
def ae_forward_reference(x, params):
    W1, b1, W2, b2, W3, b3, W4, b4 = params
    bf16, f32 = jnp.bfloat16, jnp.float32
    B, I, D = x.shape
    H = W1.shape[0]
    xb = x.astype(bf16)
    h1 = jnp.einsum("bid,hd->bih", xb, W1.astype(bf16),
                    preferred_element_type=f32) + b1
    h1 = jnp.maximum(h1, 0.0)                              # encoder Linear + ReLU
    h1f = h1.reshape(B, I * H).astype(bf16)                # Flatten
    h2 = jnp.dot(h1f, W2.T.astype(bf16), preferred_element_type=f32) + b2
    h2 = jnp.maximum(h2, 0.0)                              # encoder Linear + ReLU
    z = jnp.maximum(h2, 0.0).astype(bf16)                  # decoder leading ReLU (identity)
    h3 = jnp.dot(z, W3.T.astype(bf16), preferred_element_type=f32) + b3
    h3 = jnp.maximum(h3, 0.0)                              # decoder Linear + ReLU
    h3u = h3.reshape(B, I, H).astype(bf16)                 # Unflatten
    y = jnp.einsum("bih,dh->bid", h3u, W4.astype(bf16),
                   preferred_element_type=f32) + b4        # final Linear (no activation)
    return y


def init_ae_params(key, n_instance, n_dim, hidden_dim):
    """PyTorch-layout (out_features, in_features) params for the default AE config."""
    I, D, H = n_instance, n_dim, hidden_dim
    E = int((I * H) / 2.0)          # AE.get_coefs(1.0) -> div = 2.0 -> embed_dim
    ks = jax.random.split(key, 8)

    def linear(kw, kb, out_f, in_f):
        bound = 1.0 / np.sqrt(in_f)
        W = jax.random.uniform(kw, (out_f, in_f), jnp.float32, -bound, bound)
        b = jax.random.uniform(kb, (out_f,), jnp.float32, -bound, bound)
        return W, b

    W1, b1 = linear(ks[0], ks[1], H, D)          # encoder Linear(n_dim -> H)
    W2, b2 = linear(ks[2], ks[3], E, I * H)      # encoder Linear(I*H -> E)
    W3, b3 = linear(ks[4], ks[5], I * H, E)      # decoder Linear(E -> I*H)
    W4, b4 = linear(ks[6], ks[7], D, H)          # decoder Linear(H -> n_dim)
    return (W1, b1, W2, b2, W3, b3, W4, b4)


if __name__ == "__main__":
    B, I, D, H = 4, 8, 16, 32        # batch, n_instance, n_dim, hidden_dim
    key = jax.random.PRNGKey(0)
    kx, kp = jax.random.split(key)
    x = jax.random.normal(kx, (B, I, D), jnp.float32)
    params = init_ae_params(kp, I, D, H)

    # Weight relayout done ONCE (hoisted out of the hot forward path).
    prepared = jax.block_until_ready(prepare_ae_params(params))

    fwd = jax.jit(ae_forward_pallas)
    y = jax.block_until_ready(fwd(x, prepared))
    assert y.shape == (B, I, D)

    y_ref = jax.block_until_ready(jax.jit(ae_forward_reference)(x, params))
    np.testing.assert_allclose(np.asarray(y.astype(jnp.float32)), np.asarray(y_ref),
                               rtol=2e-2, atol=2e-2)

    print("KERNEL_OK")
</pallas_src>

<mosaic_0001>
module attributes {stable_mosaic.version = 11 : i64} {
  func.func @_ae_fused_kernel(%arg0: i32, %arg1: memref<2x8x16xf32, #tpu.memory_space<vmem>>, %arg2: memref<16x128xbf16, #tpu.memory_space<vmem>>, %arg3: memref<1x128xf32, #tpu.memory_space<vmem>>, %arg4: memref<1024x128xbf16, #tpu.memory_space<vmem>>, %arg5: memref<1x128xf32, #tpu.memory_space<vmem>>, %arg6: memref<128x1024xbf16, #tpu.memory_space<vmem>>, %arg7: memref<1x1024xf32, #tpu.memory_space<vmem>>, %arg8: memref<128x16xbf16, #tpu.memory_space<vmem>>, %arg9: memref<1x16xf32, #tpu.memory_space<vmem>>, %arg10: memref<2x8x16xbf16, #tpu.memory_space<vmem>>, %arg11: memref<2x1024xbf16, #tpu.memory_space<vmem>>) attributes {dimension_semantics = [#tpu.dimension_semantics<parallel>], iteration_bounds = array<i64: 2>, scalar_prefetch = 0 : i64, scratch_operands = 1 : i64, tpu.core_type = #tpu.core_type<tc>, window_params = [{transform_indices = @transform_0, window_bounds = array<i64: 2, 8, 16>}, {pipeline_mode = #tpu.pipeline_mode<synchronous>, transform_indices = @transform_1, window_bounds = array<i64: 16, 128>}, {pipeline_mode = #tpu.pipeline_mode<synchronous>, transform_indices = @transform_2, window_bounds = array<i64: 1, 128>}, {pipeline_mode = #tpu.pipeline_mode<synchronous>, transform_indices = @transform_3, window_bounds = array<i64: 1024, 128>}, {pipeline_mode = #tpu.pipeline_mode<synchronous>, transform_indices = @transform_4, window_bounds = array<i64: 1, 128>}, {pipeline_mode = #tpu.pipeline_mode<synchronous>, transform_indices = @transform_5, window_bounds = array<i64: 128, 1024>}, {pipeline_mode = #tpu.pipeline_mode<synchronous>, transform_indices = @transform_6, window_bounds = array<i64: 1, 1024>}, {pipeline_mode = #tpu.pipeline_mode<synchronous>, transform_indices = @transform_7, window_bounds = array<i64: 128, 16>}, {pipeline_mode = #tpu.pipeline_mode<synchronous>, transform_indices = @transform_8, window_bounds = array<i64: 1, 16>}, {transform_indices = @transform_9, window_bounds = array<i64: 2, 8, 16>}]} {
    %c0 = arith.constant 0 : index
    %c0_0 = arith.constant 0 : index
    %0 = vector.load %arg2[%c0, %c0_0] : memref<16x128xbf16, #tpu.memory_space<vmem>>, vector<16x128xbf16>
    %c0_1 = arith.constant 0 : index
    %c0_2 = arith.constant 0 : index
    %1 = vector.load %arg8[%c0_1, %c0_2] : memref<128x16xbf16, #tpu.memory_space<vmem>>, vector<128x16xbf16>
    %c0_3 = arith.constant 0 : index
    %c0_4 = arith.constant 0 : index
    %2 = vector.load %arg3[%c0_3, %c0_4] : memref<1x128xf32, #tpu.memory_space<vmem>>, vector<1x128xf32>
    %3 = vector.shape_cast %2 : vector<1x128xf32> to vector<1x128xf32>
    %4 = vector.broadcast %3 : vector<1x128xf32> to vector<2x128xf32>
    %c0_5 = arith.constant 0 : index
    %c0_6 = arith.constant 0 : index
    %5 = vector.load %arg9[%c0_5, %c0_6] : memref<1x16xf32, #tpu.memory_space<vmem>>, vector<1x16xf32>
    %6 = vector.shape_cast %5 : vector<1x16xf32> to vector<1x16xf32>
    %7 = vector.broadcast %6 : vector<1x16xf32> to vector<2x16xf32>
    %c0_7 = arith.constant 0 : index
    %c0_8 = arith.constant 0 : index
    %c0_9 = arith.constant 0 : index
    %8 = vector.load %arg1[%c0_7, %c0_8, %c0_9] : memref<2x8x16xf32, #tpu.memory_space<vmem>>, vector<2x1x16xf32>
    %9 = vector.shape_cast %8 : vector<2x1x16xf32> to vector<2x16xf32>
    %10 = arith.truncf %9 : vector<2x16xf32> to vector<2x16xbf16>
    %cst = arith.constant dense<0.000000e+00> : vector<2x128xf32>
    %11 = tpu.matmul %10, %0, %cst {dimension_numbers = #tpu.dot_dimension_numbers<[1], [0], [0], [1], [0, 0, 1, 1], [], []>} : vector<2x16xbf16>, vector<16x128xbf16>, vector<2x128xf32> -> vector<2x128xf32>
    %12 = arith.addf %11, %4 : vector<2x128xf32>
    %cst_10 = arith.constant 0.000000e+00 : f32
    %13 = vector.broadcast %cst_10 : f32 to vector<2x128xf32>
    %14 = arith.maximumf %12, %13 : vector<2x128xf32>
    %15 = arith.truncf %14 : vector<2x128xf32> to vector<2x128xbf16>
    %c0_11 = arith.constant 0 : index
    %c0_12 = arith.constant 0 : index
    %16 = vector.load %arg11[%c0_11, %c0_12] : memref<2x1024xbf16, #tpu.memory_space<vmem>>, vector<2x128xbf16>
    tpu.vector_store %arg11[%c0_11, %c0_12], %15 {strides = array<i32>} : memref<2x1024xbf16, #tpu.memory_space<vmem>>, vector<2x128xbf16>,
    %c0_13 = arith.constant 0 : index
    %c1 = arith.constant 1 : index
    %c0_14 = arith.constant 0 : index
    %17 = vector.load %arg1[%c0_13, %c1, %c0_14] : memref<2x8x16xf32, #tpu.memory_space<vmem>>, vector<2x1x16xf32>
    %18 = vector.shape_cast %17 : vector<2x1x16xf32> to vector<2x16xf32>
    %19 = arith.truncf %18 : vector<2x16xf32> to vector<2x16xbf16>
    %cst_15 = arith.constant dense<0.000000e+00> : vector<2x128xf32>
    %20 = tpu.matmul %19, %0, %cst_15 {dimension_numbers = #tpu.dot_dimension_numbers<[1], [0], [0], [1], [0, 0, 1, 1], [], []>} : vector<2x16xbf16>, vector<16x128xbf16>, vector<2x128xf32> -> vector<2x128xf32>
    %21 = arith.addf %20, %4 : vector<2x128xf32>
    %cst_16 = arith.constant 0.000000e+00 : f32
    %22 = vector.broadcast %cst_16 : f32 to vector<2x128xf32>
    %23 = arith.maximumf %21, %22 : vector<2x128xf32>
    %24 = arith.truncf %23 : vector<2x128xf32> to vector<2x128xbf16>
    %c0_17 = arith.constant 0 : index
    %c128 = arith.constant 128 : index
    %25 = vector.load %arg11[%c0_17, %c128] : memref<2x1024xbf16, #tpu.memory_space<vmem>>, vector<2x128xbf16>
    tpu.vector_store %arg11[%c0_17, %c128], %24 {strides = array<i32>} : memref<2x1024xbf16, #tpu.memory_space<vmem>>, vector<2x128xbf16>,
    %c0_18 = arith.constant 0 : index
    %c2 = arith.constant 2 : index
    %c0_19 = arith.constant 0 : index
    %26 = vector.load %arg1[%c0_18, %c2, %c0_19] : memref<2x8x16xf32, #tpu.memory_space<vmem>>, vector<2x1x16xf32>
    %27 = vector.shape_cast %26 : vector<2x1x16xf32> to vector<2x16xf32>
    %28 = arith.truncf %27 : vector<2x16xf32> to vector<2x16xbf16>
    %cst_20 = arith.constant dense<0.000000e+00> : vector<2x128xf32>
    %29 = tpu.matmul %28, %0, %cst_20 {dimension_numbers = #tpu.dot_dimension_numbers<[1], [0], [0], [1], [0, 0, 1, 1], [], []>} : vector<2x16xbf16>, vector<16x128xbf16>, vector<2x128xf32> -> vector<2x128xf32>
    %30 = arith.addf %29, %4 : vector<2x128xf32>
    %cst_21 = arith.constant 0.000000e+00 : f32
    %31 = vector.broadcast %cst_21 : f32 to vector<2x128xf32>
    %32 = arith.maximumf %30, %31 : vector<2x128xf32>
    %33 = arith.truncf %32 : vector<2x128xf32> to vector<2x128xbf16>
    %c0_22 = arith.constant 0 : index
    %c256 = arith.constant 256 : index
    %34 = vector.load %arg11[%c0_22, %c256] : memref<2x1024xbf16, #tpu.memory_space<vmem>>, vector<2x128xbf16>
    tpu.vector_store %arg11[%c0_22, %c256], %33 {strides = array<i32>} : memref<2x1024xbf16, #tpu.memory_space<vmem>>, vector<2x128xbf16>,
    %c0_23 = arith.constant 0 : index
    %c3 = arith.constant 3 : index
    %c0_24 = arith.constant 0 : index
    %35 = vector.load %arg1[%c0_23, %c3, %c0_24] : memref<2x8x16xf32, #tpu.memory_space<vmem>>, vector<2x1x16xf32>
    %36 = vector.shape_cast %35 : vector<2x1x16xf32> to vector<2x16xf32>
    %37 = arith.truncf %36 : vector<2x16xf32> to vector<2x16xbf16>
    %cst_25 = arith.constant dense<0.000000e+00> : vector<2x128xf32>
    %38 = tpu.matmul %37, %0, %cst_25 {dimension_numbers = #tpu.dot_dimension_numbers<[1], [0], [0], [1], [0, 0, 1, 1], [], []>} : vector<2x16xbf16>, vector<16x128xbf16>, vector<2x128xf32> -> vector<2x128xf32>
    %39 = arith.addf %38, %4 : vector<2x128xf32>
    %cst_26 = arith.constant 0.000000e+00 : f32
    %40 = vector.broadcast %cst_26 : f32 to vector<2x128xf32>
    %41 = arith.maximumf %39, %40 : vector<2x128xf32>
    %42 = arith.truncf %41 : vector<2x128xf32> to vector<2x128xbf16>
    %c0_27 = arith.constant 0 : index
    %c384 = arith.constant 384 : index
    %43 = vector.load %arg11[%c0_27, %c384] : memref<2x1024xbf16, #tpu.memory_space<vmem>>, vector<2x128xbf16>
    tpu.vector_store %arg11[%c0_27, %c384], %42 {strides = array<i32>} : memref<2x1024xbf16, #tpu.memory_space<vmem>>, vector<2x128xbf16>,
    %c0_28 = arith.constant 0 : index
    %c4 = arith.constant 4 : index
    %c0_29 = arith.constant 0 : index
    %44 = vector.load %arg1[%c0_28, %c4, %c0_29] : memref<2x8x16xf32, #tpu.memory_space<vmem>>, vector<2x1x16xf32>
    %45 = vector.shape_cast %44 : vector<2x1x16xf32> to vector<2x16xf32>
    %46 = arith.truncf %45 : vector<2x16xf32> to vector<2x16xbf16>
    %cst_30 = arith.constant dense<0.000000e+00> : vector<2x128xf32>
    %47 = tpu.matmul %46, %0, %cst_30 {dimension_numbers = #tpu.dot_dimension_numbers<[1], [0], [0], [1], [0, 0, 1, 1], [], []>} : vector<2x16xbf16>, vector<16x128xbf16>, vector<2x128xf32> -> vector<2x128xf32>
    %48 = arith.addf %47, %4 : vector<2x128xf32>
    %cst_31 = arith.constant 0.000000e+00 : f32
    %49 = vector.broadcast %cst_31 : f32 to vector<2x128xf32>
    %50 = arith.maximumf %48, %49 : vector<2x128xf32>
    %51 = arith.truncf %50 : vector<2x128xf32> to vector<2x128xbf16>
    %c0_32 = arith.constant 0 : index
    %c512 = arith.constant 512 : index
    %52 = vector.load %arg11[%c0_32, %c512] : memref<2x1024xbf16, #tpu.memory_space<vmem>>, vector<2x128xbf16>
    tpu.vector_store %arg11[%c0_32, %c512], %51 {strides = array<i32>} : memref<2x1024xbf16, #tpu.memory_space<vmem>>, vector<2x128xbf16>,
    %c0_33 = arith.constant 0 : index
    %c5 = arith.constant 5 : index
    %c0_34 = arith.constant 0 : index
    %53 = vector.load %arg1[%c0_33, %c5, %c0_34] : memref<2x8x16xf32, #tpu.memory_space<vmem>>, vector<2x1x16xf32>
    %54 = vector.shape_cast %53 : vector<2x1x16xf32> to vector<2x16xf32>
    %55 = arith.truncf %54 : vector<2x16xf32> to vector<2x16xbf16>
    %cst_35 = arith.constant dense<0.000000e+00> : vector<2x128xf32>
    %56 = tpu.matmul %55, %0, %cst_35 {dimension_numbers = #tpu.dot_dimension_numbers<[1], [0], [0], [1], [0, 0, 1, 1], [], []>} : vector<2x16xbf16>, vector<16x128xbf16>, vector<2x128xf32> -> vector<2x128xf32>
    %57 = arith.addf %56, %4 : vector<2x128xf32>
    %cst_36 = arith.constant 0.000000e+00 : f32
    %58 = vector.broadcast %cst_36 : f32 to vector<2x128xf32>
    %59 = arith.maximumf %57, %58 : vector<2x128xf32>
    %60 = arith.truncf %59 : vector<2x128xf32> to vector<2x128xbf16>
    %c0_37 = arith.constant 0 : index
    %c640 = arith.constant 640 : index
    %61 = vector.load %arg11[%c0_37, %c640] : memref<2x1024xbf16, #tpu.memory_space<vmem>>, vector<2x128xbf16>
    tpu.vector_store %arg11[%c0_37, %c640], %60 {strides = array<i32>} : memref<2x1024xbf16, #tpu.memory_space<vmem>>, vector<2x128xbf16>,
    %c0_38 = arith.constant 0 : index
    %c6 = arith.constant 6 : index
    %c0_39 = arith.constant 0 : index
    %62 = vector.load %arg1[%c0_38, %c6, %c0_39] : memref<2x8x16xf32, #tpu.memory_space<vmem>>, vector<2x1x16xf32>
    %63 = vector.shape_cast %62 : vector<2x1x16xf32> to vector<2x16xf32>
    %64 = arith.truncf %63 : vector<2x16xf32> to vector<2x16xbf16>
    %cst_40 = arith.constant dense<0.000000e+00> : vector<2x128xf32>
    %65 = tpu.matmul %64, %0, %cst_40 {dimension_numbers = #tpu.dot_dimension_numbers<[1], [0], [0], [1], [0, 0, 1, 1], [], []>} : vector<2x16xbf16>, vector<16x128xbf16>, vector<2x128xf32> -> vector<2x128xf32>
    %66 = arith.addf %65, %4 : vector<2x128xf32>
    %cst_41 = arith.constant 0.000000e+00 : f32
    %67 = vector.broadcast %cst_41 : f32 to vector<2x128xf32>
    %68 = arith.maximumf %66, %67 : vector<2x128xf32>
    %69 = arith.truncf %68 : vector<2x128xf32> to vector<2x128xbf16>
    %c0_42 = arith.constant 0 : index
    %c768 = arith.constant 768 : index
    %70 = vector.load %arg11[%c0_42, %c768] : memref<2x1024xbf16, #tpu.memory_space<vmem>>, vector<2x128xbf16>
    tpu.vector_store %arg11[%c0_42, %c768], %69 {strides = array<i32>} : memref<2x1024xbf16, #tpu.memory_space<vmem>>, vector<2x128xbf16>,
    %c0_43 = arith.constant 0 : index
    %c7 = arith.constant 7 : index
    %c0_44 = arith.constant 0 : index
    %71 = vector.load %arg1[%c0_43, %c7, %c0_44] : memref<2x8x16xf32, #tpu.memory_space<vmem>>, vector<2x1x16xf32>
    %72 = vector.shape_cast %71 : vector<2x1x16xf32> to vector<2x16xf32>
    %73 = arith.truncf %72 : vector<2x16xf32> to vector<2x16xbf16>
    %cst_45 = arith.constant dense<0.000000e+00> : vector<2x128xf32>
    %74 = tpu.matmul %73, %0, %cst_45 {dimension_numbers = #tpu.dot_dimension_numbers<[1], [0], [0], [1], [0, 0, 1, 1], [], []>} : vector<2x16xbf16>, vector<16x128xbf16>, vector<2x128xf32> -> vector<2x128xf32>
    %75 = arith.addf %74, %4 : vector<2x128xf32>
    %cst_46 = arith.constant 0.000000e+00 : f32
    %76 = vector.broadcast %cst_46 : f32 to vector<2x128xf32>
    %77 = arith.maximumf %75, %76 : vector<2x128xf32>
    %78 = arith.truncf %77 : vector<2x128xf32> to vector<2x128xbf16>
    %c0_47 = arith.constant 0 : index
    %c896 = arith.constant 896 : index
    %79 = vector.load %arg11[%c0_47, %c896] : memref<2x1024xbf16, #tpu.memory_space<vmem>>, vector<2x128xbf16>
    tpu.vector_store %arg11[%c0_47, %c896], %78 {strides = array<i32>} : memref<2x1024xbf16, #tpu.memory_space<vmem>>, vector<2x128xbf16>,
    %c0_48 = arith.constant 0 : index
    %c0_49 = arith.constant 0 : index
    %80 = vector.load %arg11[%c0_48, %c0_49] : memref<2x1024xbf16, #tpu.memory_space<vmem>>, vector<2x1024xbf16>
    %c0_50 = arith.constant 0 : index
    %c0_51 = arith.constant 0 : index
    %81 = vector.load %arg4[%c0_50, %c0_51] : memref<1024x128xbf16, #tpu.memory_space<vmem>>, vector<1024x128xbf16>
    %cst_52 = arith.constant dense<0.000000e+00> : vector<2x128xf32>
    %82 = tpu.matmul %80, %81, %cst_52 {dimension_numbers = #tpu.dot_dimension_numbers<[1], [0], [0], [1], [0, 0, 1, 1], [], []>} : vector<2x1024xbf16>, vector<1024x128xbf16>, vector<2x128xf32> -> vector<2x128xf32>
    %c0_53 = arith.constant 0 : index
    %c0_54 = arith.constant 0 : index
    %83 = vector.load %arg5[%c0_53, %c0_54] : memref<1x128xf32, #tpu.memory_space<vmem>>, vector<1x128xf32>
    %84 = vector.broadcast %83 : vector<1x128xf32> to vector<2x128xf32>
    %85 = arith.addf %82, %84 : vector<2x128xf32>
    %cst_55 = arith.constant 0.000000e+00 : f32
    %86 = vector.broadcast %cst_55 : f32 to vector<2x128xf32>
    %87 = arith.maximumf %85, %86 : vector<2x128xf32>
    %88 = arith.truncf %87 : vector<2x128xf32> to vector<2x128xbf16>
    %c0_56 = arith.constant 0 : index
    %c0_57 = arith.constant 0 : index
    %89 = vector.load %arg6[%c0_56, %c0_57] : memref<128x1024xbf16, #tpu.memory_space<vmem>>, vector<128x1024xbf16>
    %cst_58 = arith.constant dense<0.000000e+00> : vector<2x1024xf32>
    %90 = tpu.matmul %88, %89, %cst_58 {dimension_numbers = #tpu.dot_dimension_numbers<[1], [0], [0], [1], [0, 0, 1, 1], [], []>} : vector<2x128xbf16>, vector<128x1024xbf16>, vector<2x1024xf32> -> vector<2x1024xf32>
    %c0_59 = arith.constant 0 : index
    %c0_60 = arith.constant 0 : index
    %91 = vector.load %arg7[%c0_59, %c0_60] : memref<1x1024xf32, #tpu.memory_space<vmem>>, vector<1x1024xf32>
    %92 = vector.broadcast %91 : vector<1x1024xf32> to vector<2x1024xf32>
    %93 = arith.addf %90, %92 : vector<2x1024xf32>
    %cst_61 = arith.constant 0.000000e+00 : f32
    %94 = vector.broadcast %cst_61 : f32 to vector<2x1024xf32>
    %95 = arith.maximumf %93, %94 : vector<2x1024xf32>
    %96 = arith.truncf %95 : vector<2x1024xf32> to vector<2x1024xbf16>
    %97 = vector.extract_strided_slice %96 {offsets = [0, 0], sizes = [2, 128], strides = [1, 1]} : vector<2x1024xbf16> to vector<2x128xbf16>
    %cst_62 = arith.constant dense<0.000000e+00> : vector<2x16xf32>
    %98 = tpu.matmul %97, %1, %cst_62 {dimension_numbers = #tpu.dot_dimension_numbers<[1], [0], [0], [1], [0, 0, 1, 1], [], []>} : vector<2x128xbf16>, vector<128x16xbf16>, vector<2x16xf32> -> vector<2x16xf32>
    %99 = arith.addf %98, %7 : vector<2x16xf32>
    %100 = arith.truncf %99 : vector<2x16xf32> to vector<2x16xbf16>
    %c0_63 = arith.constant 0 : index
    %c0_64 = arith.constant 0 : index
    %c0_65 = arith.constant 0 : index
    %101 = vector.load %arg10[%c0_63, %c0_64, %c0_65] : memref<2x8x16xbf16, #tpu.memory_space<vmem>>, vector<2x1x16xbf16>
    %102 = vector.shape_cast %101 : vector<2x1x16xbf16> to vector<2x16xbf16>
    %103 = vector.shape_cast %100 : vector<2x16xbf16> to vector<2x1x16xbf16>
    tpu.vector_store %arg10[%c0_63, %c0_64, %c0_65], %103 {strides = array<i32>} : memref<2x8x16xbf16, #tpu.memory_space<vmem>>, vector<2x1x16xbf16>,
    %104 = vector.extract_strided_slice %96 {offsets = [0, 128], sizes = [2, 128], strides = [1, 1]} : vector<2x1024xbf16> to vector<2x128xbf16>
    %cst_66 = arith.constant dense<0.000000e+00> : vector<2x16xf32>
    %105 = tpu.matmul %104, %1, %cst_66 {dimension_numbers = #tpu.dot_dimension_numbers<[1], [0], [0], [1], [0, 0, 1, 1], [], []>} : vector<2x128xbf16>, vector<128x16xbf16>, vector<2x16xf32> -> vector<2x16xf32>
    %106 = arith.addf %105, %7 : vector<2x16xf32>
    %107 = arith.truncf %106 : vector<2x16xf32> to vector<2x16xbf16>
    %c0_67 = arith.constant 0 : index
    %c1_68 = arith.constant 1 : index
    %c0_69 = arith.constant 0 : index
    %108 = vector.load %arg10[%c0_67, %c1_68, %c0_69] : memref<2x8x16xbf16, #tpu.memory_space<vmem>>, vector<2x1x16xbf16>
    %109 = vector.shape_cast %108 : vector<2x1x16xbf16> to vector<2x16xbf16>
    %110 = vector.shape_cast %107 : vector<2x16xbf16> to vector<2x1x16xbf16>
    tpu.vector_store %arg10[%c0_67, %c1_68, %c0_69], %110 {strides = array<i32>} : memref<2x8x16xbf16, #tpu.memory_space<vmem>>, vector<2x1x16xbf16>,
    %111 = vector.extract_strided_slice %96 {offsets = [0, 256], sizes = [2, 128], strides = [1, 1]} : vector<2x1024xbf16> to vector<2x128xbf16>
    %cst_70 = arith.constant dense<0.000000e+00> : vector<2x16xf32>
    %112 = tpu.matmul %111, %1, %cst_70 {dimension_numbers = #tpu.dot_dimension_numbers<[1], [0], [0], [1], [0, 0, 1, 1], [], []>} : vector<2x128xbf16>, vector<128x16xbf16>, vector<2x16xf32> -> vector<2x16xf32>
    %113 = arith.addf %112, %7 : vector<2x16xf32>
    %114 = arith.truncf %113 : vector<2x16xf32> to vector<2x16xbf16>
    %c0_71 = arith.constant 0 : index
    %c2_72 = arith.constant 2 : index
    %c0_73 = arith.constant 0 : index
    %115 = vector.load %arg10[%c0_71, %c2_72, %c0_73] : memref<2x8x16xbf16, #tpu.memory_space<vmem>>, vector<2x1x16xbf16>
    %116 = vector.shape_cast %115 : vector<2x1x16xbf16> to vector<2x16xbf16>
    %117 = vector.shape_cast %114 : vector<2x16xbf16> to vector<2x1x16xbf16>
    tpu.vector_store %arg10[%c0_71, %c2_72, %c0_73], %117 {strides = array<i32>} : memref<2x8x16xbf16, #tpu.memory_space<vmem>>, vector<2x1x16xbf16>,
    %118 = vector.extract_strided_slice %96 {offsets = [0, 384], sizes = [2, 128], strides = [1, 1]} : vector<2x1024xbf16> to vector<2x128xbf16>
    %cst_74 = arith.constant dense<0.000000e+00> : vector<2x16xf32>
    %119 = tpu.matmul %118, %1, %cst_74 {dimension_numbers = #tpu.dot_dimension_numbers<[1], [0], [0], [1], [0, 0, 1, 1], [], []>} : vector<2x128xbf16>, vector<128x16xbf16>, vector<2x16xf32> -> vector<2x16xf32>
    %120 = arith.addf %119, %7 : vector<2x16xf32>
    %121 = arith.truncf %120 : vector<2x16xf32> to vector<2x16xbf16>
    %c0_75 = arith.constant 0 : index
    %c3_76 = arith.constant 3 : index
    %c0_77 = arith.constant 0 : index
    %122 = vector.load %arg10[%c0_75, %c3_76, %c0_77] : memref<2x8x16xbf16, #tpu.memory_space<vmem>>, vector<2x1x16xbf16>
    %123 = vector.shape_cast %122 : vector<2x1x16xbf16> to vector<2x16xbf16>
    %124 = vector.shape_cast %121 : vector<2x16xbf16> to vector<2x1x16xbf16>
    tpu.vector_store %arg10[%c0_75, %c3_76, %c0_77], %124 {strides = array<i32>} : memref<2x8x16xbf16, #tpu.memory_space<vmem>>, vector<2x1x16xbf16>,
    %125 = vector.extract_strided_slice %96 {offsets = [0, 512], sizes = [2, 128], strides = [1, 1]} : vector<2x1024xbf16> to vector<2x128xbf16>
    %cst_78 = arith.constant dense<0.000000e+00> : vector<2x16xf32>
    %126 = tpu.matmul %125, %1, %cst_78 {dimension_numbers = #tpu.dot_dimension_numbers<[1], [0], [0], [1], [0, 0, 1, 1], [], []>} : vector<2x128xbf16>, vector<128x16xbf16>, vector<2x16xf32> -> vector<2x16xf32>
    %127 = arith.addf %126, %7 : vector<2x16xf32>
    %128 = arith.truncf %127 : vector<2x16xf32> to vector<2x16xbf16>
    %c0_79 = arith.constant 0 : index
    %c4_80 = arith.constant 4 : index
    %c0_81 = arith.constant 0 : index
    %129 = vector.load %arg10[%c0_79, %c4_80, %c0_81] : memref<2x8x16xbf16, #tpu.memory_space<vmem>>, vector<2x1x16xbf16>
    %130 = vector.shape_cast %129 : vector<2x1x16xbf16> to vector<2x16xbf16>
    %131 = vector.shape_cast %128 : vector<2x16xbf16> to vector<2x1x16xbf16>
    tpu.vector_store %arg10[%c0_79, %c4_80, %c0_81], %131 {strides = array<i32>} : memref<2x8x16xbf16, #tpu.memory_space<vmem>>, vector<2x1x16xbf16>,
    %132 = vector.extract_strided_slice %96 {offsets = [0, 640], sizes = [2, 128], strides = [1, 1]} : vector<2x1024xbf16> to vector<2x128xbf16>
    %cst_82 = arith.constant dense<0.000000e+00> : vector<2x16xf32>
    %133 = tpu.matmul %132, %1, %cst_82 {dimension_numbers = #tpu.dot_dimension_numbers<[1], [0], [0], [1], [0, 0, 1, 1], [], []>} : vector<2x128xbf16>, vector<128x16xbf16>, vector<2x16xf32> -> vector<2x16xf32>
    %134 = arith.addf %133, %7 : vector<2x16xf32>
    %135 = arith.truncf %134 : vector<2x16xf32> to vector<2x16xbf16>
    %c0_83 = arith.constant 0 : index
    %c5_84 = arith.constant 5 : index
    %c0_85 = arith.constant 0 : index
    %136 = vector.load %arg10[%c0_83, %c5_84, %c0_85] : memref<2x8x16xbf16, #tpu.memory_space<vmem>>, vector<2x1x16xbf16>
    %137 = vector.shape_cast %136 : vector<2x1x16xbf16> to vector<2x16xbf16>
    %138 = vector.shape_cast %135 : vector<2x16xbf16> to vector<2x1x16xbf16>
    tpu.vector_store %arg10[%c0_83, %c5_84, %c0_85], %138 {strides = array<i32>} : memref<2x8x16xbf16, #tpu.memory_space<vmem>>, vector<2x1x16xbf16>,
    %139 = vector.extract_strided_slice %96 {offsets = [0, 768], sizes = [2, 128], strides = [1, 1]} : vector<2x1024xbf16> to vector<2x128xbf16>
    %cst_86 = arith.constant dense<0.000000e+00> : vector<2x16xf32>
    %140 = tpu.matmul %139, %1, %cst_86 {dimension_numbers = #tpu.dot_dimension_numbers<[1], [0], [0], [1], [0, 0, 1, 1], [], []>} : vector<2x128xbf16>, vector<128x16xbf16>, vector<2x16xf32> -> vector<2x16xf32>
    %141 = arith.addf %140, %7 : vector<2x16xf32>
    %142 = arith.truncf %141 : vector<2x16xf32> to vector<2x16xbf16>
    %c0_87 = arith.constant 0 : index
    %c6_88 = arith.constant 6 : index
    %c0_89 = arith.constant 0 : index
    %143 = vector.load %arg10[%c0_87, %c6_88, %c0_89] : memref<2x8x16xbf16, #tpu.memory_space<vmem>>, vector<2x1x16xbf16>
    %144 = vector.shape_cast %143 : vector<2x1x16xbf16> to vector<2x16xbf16>
    %145 = vector.shape_cast %142 : vector<2x16xbf16> to vector<2x1x16xbf16>
    tpu.vector_store %arg10[%c0_87, %c6_88, %c0_89], %145 {strides = array<i32>} : memref<2x8x16xbf16, #tpu.memory_space<vmem>>, vector<2x1x16xbf16>,
    %146 = vector.extract_strided_slice %96 {offsets = [0, 896], sizes = [2, 128], strides = [1, 1]} : vector<2x1024xbf16> to vector<2x128xbf16>
    %cst_90 = arith.constant dense<0.000000e+00> : vector<2x16xf32>
    %147 = tpu.matmul %146, %1, %cst_90 {dimension_numbers = #tpu.dot_dimension_numbers<[1], [0], [0], [1], [0, 0, 1, 1], [], []>} : vector<2x128xbf16>, vector<128x16xbf16>, vector<2x16xf32> -> vector<2x16xf32>
    %148 = arith.addf %147, %7 : vector<2x16xf32>
    %149 = arith.truncf %148 : vector<2x16xf32> to vector<2x16xbf16>
    %c0_91 = arith.constant 0 : index
    %c7_92 = arith.constant 7 : index
    %c0_93 = arith.constant 0 : index
    %150 = vector.load %arg10[%c0_91, %c7_92, %c0_93] : memref<2x8x16xbf16, #tpu.memory_space<vmem>>, vector<2x1x16xbf16>
    %151 = vector.shape_cast %150 : vector<2x1x16xbf16> to vector<2x16xbf16>
    %152 = vector.shape_cast %149 : vector<2x16xbf16> to vector<2x1x16xbf16>
    tpu.vector_store %arg10[%c0_91, %c7_92, %c0_93], %152 {strides = array<i32>} : memref<2x8x16xbf16, #tpu.memory_space<vmem>>, vector<2x1x16xbf16>,
    return
  }
  func.func @transform_0(%arg0: i32) -> (i32, i32, i32) {
    %c0_i32 = arith.constant 0 : i32
    %c0_i32_0 = arith.constant 0 : i32
    %c0_i32_1 = arith.constant 0 : i32
    return %arg0, %c0_i32, %c0_i32_0 : i32, i32, i32
  }
  func.func @transform_1(%arg0: i32) -> (i32, i32) {
    %c0_i32 = arith.constant 0 : i32
    %c0_i32_0 = arith.constant 0 : i32
    %c0_i32_1 = arith.constant 0 : i32
    return %c0_i32, %c0_i32_0 : i32, i32
  }
  func.func @transform_2(%arg0: i32) -> (i32, i32) {
    %c0_i32 = arith.constant 0 : i32
    %c0_i32_0 = arith.constant 0 : i32
    %c0_i32_1 = arith.constant 0 : i32
    return %c0_i32, %c0_i32_0 : i32, i32
  }
  func.func @transform_3(%arg0: i32) -> (i32, i32) {
    %c0_i32 = arith.constant 0 : i32
    %c0_i32_0 = arith.constant 0 : i32
    %c0_i32_1 = arith.constant 0 : i32
    return %c0_i32, %c0_i32_0 : i32, i32
  }
  func.func @transform_4(%arg0: i32) -> (i32, i32) {
    %c0_i32 = arith.constant 0 : i32
    %c0_i32_0 = arith.constant 0 : i32
    %c0_i32_1 = arith.constant 0 : i32
    return %c0_i32, %c0_i32_0 : i32, i32
  }
  func.func @transform_5(%arg0: i32) -> (i32, i32) {
    %c0_i32 = arith.constant 0 : i32
    %c0_i32_0 = arith.constant 0 : i32
    %c0_i32_1 = arith.constant 0 : i32
    return %c0_i32, %c0_i32_0 : i32, i32
  }
  func.func @transform_6(%arg0: i32) -> (i32, i32) {
    %c0_i32 = arith.constant 0 : i32
    %c0_i32_0 = arith.constant 0 : i32
    %c0_i32_1 = arith.constant 0 : i32
    return %c0_i32, %c0_i32_0 : i32, i32
  }
  func.func @transform_7(%arg0: i32) -> (i32, i32) {
    %c0_i32 = arith.constant 0 : i32
    %c0_i32_0 = arith.constant 0 : i32
    %c0_i32_1 = arith.constant 0 : i32
    return %c0_i32, %c0_i32_0 : i32, i32
  }
  func.func @transform_8(%arg0: i32) -> (i32, i32) {
    %c0_i32 = arith.constant 0 : i32
    %c0_i32_0 = arith.constant 0 : i32
    %c0_i32_1 = arith.constant 0 : i32
    return %c0_i32, %c0_i32_0 : i32, i32
  }
  func.func @transform_9(%arg0: i32) -> (i32, i32, i32) {
    %c0_i32 = arith.constant 0 : i32
    %c0_i32_0 = arith.constant 0 : i32
    %c0_i32_1 = arith.constant 0 : i32
    return %arg0, %c0_i32, %c0_i32_0 : i32, i32, i32
  }
}

</mosaic_0001>

<bundles_post_ra>
// kernel: ae_forward_pallas.1
= control target key start
LH: loop header
LB: loop body
LE: loop exit
PB: predicated region body
PF: predicated region fallthrough
CT: control target
= control target key end

     0   :  { %s3603_s0 = inlined_call_operand.vmem [shape: f32[4,8,16], index: 0, kind: input, shape index: {}]   ;;  %s3604_s1 = inlined_call_operand.vmem [shape: bf16[16,128], index: 1, kind: input, shape index: {}]   ;;  %s3605_s2 = inlined_call_operand.vmem [shape: f32[1,128], index: 2, kind: input, shape index: {}]   ;;  %s3606_s3 = inlined_call_operand.hbm [shape: bf16[1024,128], index: 3, kind: input, shape index: {}]   ;;  %s3607_s4 = inlined_call_operand.vmem [shape: f32[1,128], index: 4, kind: input, shape index: {}]   ;;  %s3608_s5 = inlined_call_operand.hbm [shape: bf16[128,1024], index: 5, kind: input, shape index: {}]   ;;  %s3609_s6 = inlined_call_operand.vmem [shape: f32[1,1024], index: 6, kind: input, shape index: {}]   ;;  %s3610_s7 = inlined_call_operand.vmem [shape: bf16[128,16], index: 7, kind: input, shape index: {}]   ;;  %s3611_s8 = inlined_call_operand.vmem [shape: f32[1,16], index: 8, kind: input, shape index: {}]   ;;  %s3612_s9 = inlined_call_operand.hbm [shape: bf16[4,8,16], index: 9, kind: output, shape index: {}]  }
   0x1   :  { %3613 = sst [smem:[#allocation12_spill]] %s3606_s3 }
   0x2   :  { %14 = vsyncpa [#allocation4], 0 }
   0x3   :  { %15 = vsyncpa [#allocation7], 0 }
   0x4   :  { %16 = vsyncpa [#allocation5], 0 }
   0x5   :  { %18 = vsyncpa [#allocation5 + $0x1], 0  ;;  %s3286_s30 = smov 0   ;;  %s3288_s10 = smov 0  }
   0x6   :  { %s3290_s11 = smov 0   ;;  %s3292_s12 = smov 0  }
   0x7 LB: > { %s3307_s13 = sadd.s32 4294967295, %s3225_s12   ;;  %s2307_s14 = sadd.s32 4294967294, %s3225_s12   ;;  %s3225_s12 = sphi %s3292_s12, %s3631_s12   ;;  %s3221_s11 = sphi %s3290_s11, %s3630_s11   ;;  %s3217_s10 = sphi %s3288_s10, %s3629_s10   ;;  %s3213_s30 = sphi %s3286_s30, %s3628_s30  }
   0x8   : > { %s3311_s15 = sadd.s32 1, %s3225_s12   ;;  %s225_s16 = sadd.s32 1, %s3221_s11 }
   0x9   : > { %s222_s17 = ssub.s32 %s3225_s12, %s3311_s15  ;;  %p235_p0 = scmp.ne.s32.totalorder %s3221_s11, %s3217_s10 }
   0xa   : > { %p223_p1 = scmp.eq.s32.totalorder %s222_s17, 0  ;;  %p236_p2 = scmp.eq.s32.totalorder %s3307_s13, 1 }
   0xb   : > { %p241_p3 = scmp.ne.s32.totalorder %s3217_s10, %s3213_s30  ;;  %p242_p4 = scmp.eq.s32.totalorder %s2307_s14, 1 }
   0xc   : > { %s3322_s18 = scalar_select %p223_p1, %s3221_s11, %s225_s16  }
   0xd   : > { %p3324_p5 = por %p236_p2, %p235_p0  ;;  %p3328_p6 = por %p242_p4, %p241_p3 }
   0xe   : > { %p2308_p7 = scmp.ge.s32.totalorder %s3225_s12, 1  ;;  %p249_p8 = scmp.lt.s32.totalorder %s3225_s12, 3 }
   0xf   : > { %p3046_p9 = scmp.eq.s32.totalorder %s3307_s13, 0  ;;  %s3617_s3 = sld [smem:[#allocation12_spill]] }
  0x10   : > { %p3335_p10 = pnand %p2308_p7, %p249_p8  ;;  %s3227_s25 = smov [#allocation3]  }
  0x11   : > { %s268_s26 = sshll.u32 %s3227_s25, 4  ;;  %s283_s29 = sshll.u32 %s3608_s5, 4  ;;  %s269_s26 = int_to_ptr.vmem [resolvable:$true] %s268_s26  ;;  %s284_s29 = int_to_ptr.hbm [resolvable:$true] %s283_s29 }
  0x12   : > { %p3035_p11 = pneg %p3335_p10  ;;  %s3228_s14 = smov 64  }
  0x13   : > { %s3229_s16 = smov 4   ;;  %s3230_s17 = smov [#allocation6]  }
  0x14   : > { %p3036_p12 = pnand %p3046_p9, %p3035_p11  ;;  %s285_s22 = sshll.u32 %s3230_s17, 4  ;;  %s286_s22 = int_to_ptr.vmem [resolvable:$true] %s285_s22 }
  0x15   : > { %s266_s24 = sshll.u32 %s3617_s3, 4  ;;  %s3231_s23 = smov 512   ;;  %s267_s24 = int_to_ptr.hbm [resolvable:$true] %s266_s24 }
  0x16   : > { %3038 = dma.hbm_to_vmem [thread:$0]  (!%p3036_p12), %s267_s24, 8192, %s269_s26, [#allocation4], %s3228_s14, %s3228_s14, %s3229_s16  }
  0x17   : > { %s3232_s3 = smov 32   ;;  %319 = sbr.rel (%p3335_p10) target bundleno = 691 (0x2b3), region = 56 }
  0x18   : > { %3041 = dma.hbm_to_vmem [thread:$0]  (!%p3036_p12), %s284_s29, 8192, %s286_s22, [#allocation7], %s3231_s23, %s3231_s23, %s3232_s3  }
  0x1c   : > { %3200 = dma.done.wait (%p3046_p9), [#allocation4], 8192  }
  0x1d   : > { %3202 = vsyncadd (%p3046_p9), [#allocation4], 4294959104 }
  0x1e   : > { %3204 = dma.done.wait (%p3046_p9), [#allocation7], 8192  }
  0x1f   : > { %3206 = vsyncadd (%p3046_p9), [#allocation7], 4294959104  ;;  %s2316_s24 = sshll.u32 %s3307_s13, 1  ;;  %v2887_v0 = vld [vmem:[%s3604_s1] sm:$0xff]  ;;  %vm404_vm0 = vcmask 1041409   ;;  %vm413_vm1 = vcmask 130048  }
  0x20   : > { %p362_p13 = scmp.lt.s32.totalorder %s2316_s24, 3  ;;  %424 = vmatpush.bf16.msra.mxu0 %v2887_v0  ;;  %454 = vmatpush.bf16.msra.mxu1 %v2887_v0  ;;  %s358_s27 = sand.u32 1, %s3217_s10   ;;  %vm1866_vm2 = vcmask 1040384   ;;  %vm1885_vm3 = vcmask 122880   ;;  %vm1886_vm4 = vsmask.f32 256 }
  0x21   : > { %484 = vmatpush.bf16.msra.mxu2 %v2887_v0  ;;  %514 = vmatpush.bf16.msra.mxu3 %v2887_v0  ;;  %s2315_s28 = sshll.u32 %s358_s27, 3  ;;  %vm1887_vm5 = vmand %vm1885_vm3, %vm1886_vm4  ;;  %vm1932_vm6 = vsmask.f32 7938  ;;  %vm1974_vm8 = vcmask 123905   ;;  %vm1975_vm9 = vsmask.f32 1280 }
  0x22   : > { %s3633_s24 = smov (!%p362_p13, %s2316_s24), 3  ;;  %s3457_s29 = scalar_lea.vmem [#allocation8], %s2315_s28  ;;  %vm3469_vm7 = vmand %vm1885_vm3, %vm1932_vm6  ;;  %vm2063_vm10 = vcmask 124930   ;;  %vm2064_vm12 = vsmask.f32 2304  ;;  %vm2152_vm3 = vcmask 125955  }
  0x23   : > { %s2317_s3 = sshll.u32 %s3633_s24, 3  ;;  %vm3485_vm11 = vmand %vm1974_vm8, %vm1975_vm9  ;;  %vm2021_vm14 = vsmask.f32 7942  ;;  %vm2153_vm4 = vsmask.f32 3328  ;;  %s3024_s14 = sshll.u32 %s3307_s13, 3 }
  0x24   : > { %s3363_s26 = scalar_lea.vmem %s3603_s0, %s2317_s3  ;;  %544 = vmatpush.bf16.msrb.mxu0 %v2887_v0  ;;  %574 = vmatpush.bf16.msrb.mxu1 %v2887_v0  ;;  %vm3502_vm13 = vmand %vm2063_vm10, %vm2064_vm12  ;;  %vm2199_vm6 = vsmask.f32 7950  ;;  %s2219_s22 = scalar_lea.hbm %s3612_s9, %s3024_s14 }
  0x25   : > { %v395_v1 = vld [vmem:[%s3363_s26] sm:$0x1]  ;;  %v396_v2 = vld [vmem:[%s3363_s26 + $0x8] sm:$0x1]  ;;  %v433_v5 = vld [vmem:[%s3363_s26 + $0x1] sm:$0x1]  ;;  %604 = vmatpush.bf16.msrb.mxu2 %v2887_v0  ;;  %634 = vmatpush.bf16.msrb.mxu3 %v2887_v0 }
  0x26   : > { %v397_v3 = vpack.c.bf16 %v395_v1, %v395_v1  ;;  %v398_v4 = vpack.c.bf16 %v396_v2, %v396_v2  ;;  %v434_v6 = vld [vmem:[%s3363_s26 + $0x9] sm:$0x1]  ;;  %v463_v7 = vld [vmem:[%s3363_s26 + $0x2] sm:$0x1]  ;;  %v435_v8 = vpack.c.bf16 %v433_v5, %v433_v5  ;;  %v464_v10 = vld [vmem:[%s3363_s26 + $0xa] sm:$0x1] }
  0x27   : > { %v436_v9 = vpack.c.bf16 %v434_v6, %v434_v6  ;;  %v465_v11 = vpack.c.bf16 %v463_v7, %v463_v7  ;;  %v493_v12 = vld [vmem:[%s3363_s26 + $0x3] sm:$0x1]  ;;  %v494_v13 = vld [vmem:[%s3363_s26 + $0xb] sm:$0x1]  ;;  %v466_v16 = vpack.c.bf16 %v464_v10, %v464_v10  ;;  %v524_v21 = vld [vmem:[%s3363_s26 + $0xc] sm:$0x1] }
  0x28   : > { %v401_v14 = vunpack.c.l.b16 %v397_v3  ;;  %v402_v15 = vunpack.c.l.b16 %v398_v4  ;;  %v495_v17 = vpack.c.bf16 %v493_v12, %v493_v12  ;;  %v439_v18 = vunpack.c.l.b16 %v435_v8  ;;  %v554_v25 = vld [vmem:[%s3363_s26 + $0xd] sm:$0x1]  ;;  %v523_v35 = vld [vmem:[%s3363_s26 + $0x4] sm:$0x1]  ;;  %v584_v37 = vld [vmem:[%s3363_s26 + $0xe] sm:$0x1] }
  0x29   : > { %v440_v19 = vunpack.c.l.b16 %v436_v9  ;;  %v496_v20 = vpack.c.bf16 %v494_v13, %v494_v13  ;;  %v469_v23 = vunpack.c.l.b16 %v465_v11  ;;  %v470_v24 = vunpack.c.l.b16 %v466_v16  ;;  %v553_v40 = vld [vmem:[%s3363_s26 + $0x5] sm:$0x1]  ;;  %v614_v41 = vld [vmem:[%s3363_s26 + $0xf] sm:$0x1]  ;;  %v583_v44 = vld [vmem:[%s3363_s26 + $0x6] sm:$0x1] }
  0x2a   : > { %v403_v22 = vrot.slane %v402_v15, 7  ;;  %v499_v27 = vunpack.c.l.b16 %v495_v17  ;;  %v526_v31 = vpack.c.bf16 %v524_v21, %v524_v21  ;;  %v556_v36 = vpack.c.bf16 %v554_v25, %v554_v25  ;;  %v613_v49 = vld [vmem:[%s3363_s26 + $0x7] sm:$0x1]  ;;  %v2903_v9 = vld [vmem:[#allocation3 + $0x38] sm:$0xff]  ;;  %v2901_v17 = vld [vmem:[#allocation3 + $0x28] sm:$0xff]  ;;  %s2220_s23 = sshll.u32 %s3457_s29, 4  ;;  %s2221_s23 = int_to_ptr.vmem [resolvable:$true] %s2220_s23 }
  0x2b   : > { %v441_v26 = vrot.slane %v440_v19, 7  ;;  %v500_v28 = vunpack.c.l.b16 %v496_v20  ;;  %v471_v30 = vrot.slane %v470_v24, 7  ;;  %v525_v46 = vpack.c.bf16 %v523_v35, %v523_v35  ;;  %v2911_v10 = vld [vmem:[#allocation3 + $0x78] sm:$0xff]  ;;  %v2902_v13 = vld [vmem:[#allocation3 + $0x30] sm:$0xff]  ;;  %v2917_v19 = vld [vmem:[#allocation3 + $0xa8] sm:$0xff]  ;;  %s2222_s24 = sshll.u32 %s2219_s22, 4  ;;  %s2223_s24 = int_to_ptr.hbm [resolvable:$true] %s2222_s24 }
  0x2c   : > { %v405_v29 = vsel %vm404_vm0, %v403_v22, %v401_v14  ;;  %v530_v47 = vunpack.c.l.b16 %v526_v31  ;;  %v586_v48 = vpack.c.bf16 %v584_v37, %v584_v37  ;;  %v555_v50 = vpack.c.bf16 %v553_v40, %v553_v40  ;;  %v2919_v11 = vld [vmem:[#allocation3 + $0xb8] sm:$0xff]  ;;  %v2910_v14 = vld [vmem:[#allocation3 + $0x70] sm:$0xff]  ;;  %v2925_v20 = vld [vmem:[#allocation3 + $0xe8] sm:$0xff]  ;;  %s2208_s13 = scalar_lea.sflag [#allocation5], %s358_s27  ;;  %s3169_s3 = sshra.s32 %s2223_s24, 4  ;;  %s3170_s3 = int_to_ptr.hbm [resolvable:$true] %s3169_s3 }
  0x2d   : > { %v406_v32 = vpack.c.b16 %v405_v29, %v405_v29  ;;  %v442_v33 = vsel %vm404_vm0, %v441_v26, %v439_v18  ;;  %v501_v34 = vrot.slane %v500_v28, 7  ;;  %v472_v39 = vsel %vm404_vm0, %v471_v30, %v469_v23  ;;  %v2927_v12 = vld [vmem:[#allocation3 + $0xf8] sm:$0xff]  ;;  %v2918_v15 = vld [vmem:[#allocation3 + $0xb0] sm:$0xff]  ;;  %v2909_v18 = vld [vmem:[#allocation3 + $0x68] sm:$0xff]  ;;  %s3171_s25 = scalar_lea.hbm %s3170_s3, 8  ;;  %s3175_s28 = scalar_lea.hbm %s3612_s9, 16 }
  0x2e   : > { %v443_v38 = vpack.c.b16 %v442_v33, %v442_v33  ;;  %v473_v42 = vpack.c.b16 %v472_v39, %v472_v39  ;;  %v560_v51 = vunpack.c.l.b16 %v556_v36  ;;  %v616_v52 = vpack.c.bf16 %v614_v41, %v614_v41  ;;  %v2926_v16 = vld [vmem:[#allocation3 + $0xf0] sm:$0xff]  ;;  %v2900_v21 = vld [vmem:[#allocation3 + $0x20] sm:$0xff]  ;;  %v2899_v25 = vld [vmem:[#allocation3 + $0x18] sm:$0xff]  ;;  %p3172_p0 = scmp.ne.s32.totalorder %s3170_s3, %s3171_s25  ;;  %p3176_p3 = scmp.lt.s32.totalorder %s3170_s3, %s3612_s9 }
  0x2f   : > { %2322 = vmatmul.msk.bf16.vlgmr.msra.gmra.mxu0 %vm413_vm1, %v406_v32  ;;  %v502_v43 = vsel %vm404_vm0, %v501_v34, %v499_v27  ;;  %v585_v53 = vpack.c.bf16 %v583_v44, %v583_v44  ;;  %v590_v54 = vunpack.c.l.b16 %v586_v48  ;;  %v615_v55 = vpack.c.bf16 %v613_v49, %v613_v49  ;;  %v2908_v22 = vld [vmem:[#allocation3 + $0x60] sm:$0xff]  ;;  %v2907_v26 = vld [vmem:[#allocation3 + $0x58] sm:$0xff]  ;;  %v2898_v29 = vld [vmem:[#allocation3 + $0x10] sm:$0xff]  ;;  %p3177_p4 = scmp.lt.s32.totalorder %s3175_s28, %s3171_s25 }
  0x30   : > { %2323 = vmatmul.msk.bf16.vlgmr.msra.gmra.mxu1 %vm413_vm1, %v443_v38  ;;  %v503_v45 = vpack.c.b16 %v502_v43, %v502_v43  ;;  %2324 = vmatmul.msk.bf16.vlgmr.msra.gmra.mxu2 %vm413_vm1, %v473_v42  ;;  %v620_v56 = vunpack.c.l.b16 %v616_v52  ;;  %v529_v57 = vunpack.c.l.b16 %v525_v46  ;;  %v531_v58 = vrot.slane %v530_v47, 7  ;;  %v2916_v23 = vld [vmem:[#allocation3 + $0xa0] sm:$0xff]  ;;  %v2915_v27 = vld [vmem:[#allocation3 + $0x98] sm:$0xff]  ;;  %v2906_v30 = vld [vmem:[#allocation3 + $0x50] sm:$0xff]  ;;  %p3173_p1 = pnand %p3172_p0, %p3324_p5 }
  0x31   : > { %v559_v59 = vunpack.c.l.b16 %v555_v50  ;;  %v561_v60 = vrot.slane %v560_v51, 7  ;;  %v589_v61 = vunpack.c.l.b16 %v585_v53  ;;  %v591_v62 = vrot.slane %v590_v54, 7  ;;  %1178 = vmatpush.bf16.msra.mxu0 %v2903_v9  ;;  %1191 = vmatpush.bf16.msra.mxu1 %v2911_v10  ;;  %v2924_v24 = vld [vmem:[#allocation3 + $0xe0] sm:$0xff]  ;;  %v2923_v28 = vld [vmem:[#allocation3 + $0xd8] sm:$0xff]  ;;  %v2914_v31 = vld [vmem:[#allocation3 + $0x90] sm:$0xff]  ;;  %p3178_p7 = por %p3177_p4, %p3176_p3 }
  0x32   : > { %2325 = vmatmul.msk.bf16.vlgmr.msra.gmra.mxu3 %vm413_vm1, %v503_v45  ;;  %v619_v63 = vunpack.c.l.b16 %v615_v55  ;;  %v621_v0 = vrot.slane %v620_v56, 7  ;;  %v532_v1 = vsel %vm404_vm0, %v531_v58, %v529_v57  ;;  %1204 = vmatpush.bf16.msra.mxu2 %v2919_v11  ;;  %v2922_v32 = vld [vmem:[#allocation3 + $0xd0] sm:$0xff]  ;;  %v2897_v33 = vld [vmem:[#allocation3 + $0x8] sm:$0xff]  ;;  %v2896_v38 = vld [vmem:[#allocation3] sm:$0xff]  ;;  %p3174_p2 = pneg %p3173_p1 }
  0x33   : > { %v562_v2 = vsel %vm404_vm0, %v561_v60, %v559_v59  ;;  %v592_v3 = vsel %vm404_vm0, %v591_v62, %v589_v61  ;;  %v533_v4 = vpack.c.b16 %v532_v1, %v532_v1  ;;  %1217 = vmatpush.bf16.msra.mxu3 %v2927_v12  ;;  %v2905_v34 = vld [vmem:[#allocation3 + $0x48] sm:$0xff]  ;;  %v3403_v37 = vld [vmem:[%s3605_s2] ss:$0 sm:$0xff]  ;;  %v2904_v39 = vld [vmem:[#allocation3 + $0x40] sm:$0xff] }
  0x34   : > { %v622_v5 = vsel %vm404_vm0, %v621_v0, %v619_v63  ;;  %v563_v6 = vpack.c.b16 %v562_v2, %v562_v2  ;;  %v593_v7 = vpack.c.b16 %v592_v3, %v592_v3  ;;  %v2913_v35 = vld [vmem:[#allocation3 + $0x88] sm:$0xff]  ;;  %v2912_v40 = vld [vmem:[#allocation3 + $0x80] sm:$0xff]  ;;  %v2935_v42 = vld [vmem:[#allocation3 + $0x138] sm:$0xff]  ;;  %vm2110_vm0 = vsmask.f32 7946  ;;  %p3179_p8 = pnand %p3178_p7, %p3174_p2 }
  0x35   : > { %v623_v8 = vpack.c.b16 %v622_v5, %v622_v5  ;;  %1179 = vmatpush.bf16.msra.mxu0 %v2902_v13  ;;  %1192 = vmatpush.bf16.msra.mxu1 %v2910_v14  ;;  %v2921_v36 = vld [vmem:[#allocation3 + $0xc8] sm:$0xff]  ;;  %v2920_v41 = vld [vmem:[#allocation3 + $0xc0] sm:$0xff]  ;;  %v2943_v43 = vld [vmem:[#allocation3 + $0x178] sm:$0xff] }
  0x36   : > { %1205 = vmatpush.bf16.msra.mxu2 %v2918_v15  ;;  %v2951_v45 = vld [vmem:[#allocation3 + $0x1b8] sm:$0xff]  ;;  %v2934_v51 = vld [vmem:[#allocation3 + $0x130] sm:$0xff]  ;;  %v2933_v58 = vld [vmem:[#allocation3 + $0x128] sm:$0xff] }
  0x37   : > { %1218 = vmatpush.bf16.msra.mxu3 %v2926_v16  ;;  %v2959_v46 = vld [vmem:[#allocation3 + $0x1f8] sm:$0xff]  ;;  %v2942_v52 = vld [vmem:[#allocation3 + $0x170] sm:$0xff]  ;;  %v2941_v59 = vld [vmem:[#allocation3 + $0x168] sm:$0xff] }
  0x38   : > { %v2950_v53 = vld [vmem:[#allocation3 + $0x1b0] sm:$0xff]  ;;  %v2949_v60 = vld [vmem:[#allocation3 + $0x1a8] sm:$0xff]  ;;  %v2940_v5 = vld [vmem:[#allocation3 + $0x160] sm:$0xff] }
  0x39   : > { %1180 = vmatpush.bf16.msra.mxu0 %v2901_v17  ;;  %1193 = vmatpush.bf16.msra.mxu1 %v2909_v18  ;;  %v2958_v55 = vld [vmem:[#allocation3 + $0x1f0] sm:$0xff]  ;;  %v2957_v63 = vld [vmem:[#allocation3 + $0x1e8] sm:$0xff]  ;;  %v2931_v14 = vld [vmem:[#allocation3 + $0x118] sm:$0xff] }
  0x3a   : > { %1206 = vmatpush.bf16.msra.mxu2 %v2917_v19  ;;  %v2939_v15 = vld [vmem:[#allocation3 + $0x158] sm:$0xff]  ;;  %vm3522_vm15 = vmand %vm1974_vm8, %vm2021_vm14 }
  0x3b   : > { %1219 = vmatpush.bf16.msra.mxu3 %v2925_v20  ;;  %v2947_v16 = vld [vmem:[#allocation3 + $0x198] sm:$0xff] }
  0x3c   : > { %v2955_v20 = vld [vmem:[#allocation3 + $0x1d8] sm:$0xff] }
  0x3d   : > { %1181 = vmatpush.bf16.msra.mxu0 %v2900_v21  ;;  %1194 = vmatpush.bf16.msra.mxu1 %v2908_v22  ;;  %v2930_v22 = vld [vmem:[#allocation3 + $0x110] sm:$0xff] }
  0x3e   : > { %1207 = vmatpush.bf16.msra.mxu2 %v2916_v23  ;;  %v2938_v23 = vld [vmem:[#allocation3 + $0x150] sm:$0xff] }
  0x3f   : > { %2326 = vmatmul.msk.bf16.vlgmr.msrb.gmra.mxu0 %vm413_vm1, %v533_v4  ;;  %1220 = vmatpush.bf16.msra.mxu3 %v2924_v24  ;;  %v2932_v4 = vld [vmem:[#allocation3 + $0x120] sm:$0xff] }
  0x40   : > { %2327 = vmatmul.msk.bf16.vlgmr.msrb.gmra.mxu1 %vm413_vm1, %v563_v6  ;;  %2328 = vmatmul.msk.bf16.vlgmr.msrb.gmra.mxu2 %vm413_vm1, %v593_v7  ;;  %v2948_v7 = vld [vmem:[#allocation3 + $0x1a0] sm:$0xff] }
  0x41   : > { %1182 = vmatpush.bf16.msra.mxu0 %v2899_v25  ;;  %1195 = vmatpush.bf16.msra.mxu1 %v2907_v26  ;;  %v2946_v25 = vld [vmem:[#allocation3 + $0x190] sm:$0xff] }
  0x42   : > { %2329 = vmatmul.msk.bf16.vlgmr.msrb.gmra.mxu3 %vm413_vm1, %v623_v8  ;;  %1208 = vmatpush.bf16.msra.mxu2 %v2915_v27  ;;  %v2956_v8 = vld [vmem:[#allocation3 + $0x1e0] sm:$0xff]  ;;  %v2954_v26 = vld [vmem:[#allocation3 + $0x1d0] sm:$0xff]  ;;  %vm3533_vm1 = vmand %vm2063_vm10, %vm2110_vm0 }
  0x43   : > { %1221 = vmatpush.bf16.msra.mxu3 %v2923_v28 }
  0x45   : > { %1183 = vmatpush.bf16.msra.mxu0 %v2898_v29  ;;  %1196 = vmatpush.bf16.msra.mxu1 %v2906_v30  ;;  %v2929_v30 = vld [vmem:[#allocation3 + $0x108] sm:$0xff] }
  0x46   : > { %1209 = vmatpush.bf16.msra.mxu2 %v2914_v31  ;;  %v2937_v31 = vld [vmem:[#allocation3 + $0x148] sm:$0xff] }
  0x47   : > { %1222 = vmatpush.bf16.msra.mxu3 %v2922_v32  ;;  %v2945_v32 = vld [vmem:[#allocation3 + $0x188] sm:$0xff] }
  0x49   : > { %1184 = vmatpush.bf16.msra.mxu0 %v2897_v33  ;;  %1197 = vmatpush.bf16.msra.mxu1 %v2905_v34  ;;  %v2953_v33 = vld [vmem:[#allocation3 + $0x1c8] sm:$0xff] }
  0x4a   : > { %1210 = vmatpush.bf16.msra.mxu2 %v2913_v35 }
  0x4b   : > { %1223 = vmatpush.bf16.msra.mxu3 %v2921_v36 }
  0x4d   : > { %1185 = vmatpush.bf16.msra.mxu0 %v2896_v38  ;;  %1198 = vmatpush.bf16.msra.mxu1 %v2904_v39 }
  0x4e   : > { %1211 = vmatpush.bf16.msra.mxu2 %v2912_v40 }
  0x4f   : > { %1224 = vmatpush.bf16.msra.mxu3 %v2920_v41  ;;  %v2928_v41 = vld [vmem:[#allocation3 + $0x100] sm:$0xff] }
  0x51   : > { %1230 = vmatpush.bf16.msrb.mxu0 %v2935_v42  ;;  %1243 = vmatpush.bf16.msrb.mxu1 %v2943_v43  ;;  %v2936_v42 = vld [vmem:[#allocation3 + $0x140] sm:$0xff] }
  0x52   : > { %1256 = vmatpush.bf16.msrb.mxu2 %v2951_v45  ;;  %v2952_v45 = vld [vmem:[#allocation3 + $0x1c0] sm:$0xff] }
  0x53   : > { %1269 = vmatpush.bf16.msrb.mxu3 %v2959_v46 }
  0x55   : > { %1231 = vmatpush.bf16.msrb.mxu0 %v2934_v51  ;;  %1244 = vmatpush.bf16.msrb.mxu1 %v2942_v52  ;;  %v2812_v51 = vld [vmem:[#allocation6 + $0x1c0] sm:$0xf] }
  0x56   : > { %1257 = vmatpush.bf16.msrb.mxu2 %v2950_v53  ;;  %v3020_v52 = vld [vmem:[#allocation6 + $0x1dc] sm:$0xf0]  ;;  %v3016_v53 = vld [vmem:[#allocation6 + $0x1c4] sm:$0xf] }
  0x57   : > { %1270 = vmatpush.bf16.msrb.mxu3 %v2958_v55  ;;  %v2820_v55 = vld [vmem:[#allocation6 + $0x1c8] sm:$0xf] }
  0x59   : > { %1232 = vmatpush.bf16.msrb.mxu0 %v2933_v58  ;;  %1245 = vmatpush.bf16.msrb.mxu1 %v2941_v59  ;;  %v2822_v58 = vld [vmem:[#allocation6 + $0x1e8] sm:$0xf0]  ;;  %v2780_v59 = vld [vmem:[#allocation6 + $0x180] sm:$0xf] }
  0x5a   : > { %1258 = vmatpush.bf16.msrb.mxu2 %v2949_v60  ;;  %v3012_v60 = vld [vmem:[#allocation6 + $0x19c] sm:$0xf0] }
  0x5b   : > { %1271 = vmatpush.bf16.msrb.mxu3 %v2957_v63 }
  0x5d   : > { %1233 = vmatpush.bf16.msrb.mxu0 %v2932_v4  ;;  %1246 = vmatpush.bf16.msrb.mxu1 %v2940_v5 }
  0x5e   : > { %1259 = vmatpush.bf16.msrb.mxu2 %v2948_v7 }
  0x5f   : > { %1272 = vmatpush.bf16.msrb.mxu3 %v2956_v8 }
  0x61   : > { %1234 = vmatpush.bf16.msrb.mxu0 %v2931_v14  ;;  %1247 = vmatpush.bf16.msrb.mxu1 %v2939_v15  ;;  %v3004_v14 = vld [vmem:[#allocation6 + $0x15c] sm:$0xf0] }
  0x62   : > { %1260 = vmatpush.bf16.msrb.mxu2 %v2947_v16 }
  0x63   : > { %1273 = vmatpush.bf16.msrb.mxu3 %v2955_v20  ;;  %v3005_v20 = vld [vmem:[#allocation6 + $0x164] sm:$0xf0] }
  0x65   : > { %1235 = vmatpush.bf16.msrb.mxu0 %v2930_v22  ;;  %1248 = vmatpush.bf16.msrb.mxu1 %v2938_v23  ;;  %v2758_v22 = vld [vmem:[#allocation6 + $0x168] sm:$0xf0] }
  0x66   : > { %1261 = vmatpush.bf16.msrb.mxu2 %v2946_v25  ;;  %v2716_v25 = vld [vmem:[#allocation6 + $0x100] sm:$0xf] }
  0x67   : > { %1274 = vmatpush.bf16.msrb.mxu3 %v2954_v26  ;;  %v2996_v26 = vld [vmem:[#allocation6 + $0x11c] sm:$0xf0] }
  0x69   : > { %1236 = vmatpush.bf16.msrb.mxu0 %v2929_v30  ;;  %1249 = vmatpush.bf16.msrb.mxu1 %v2937_v31  ;;  %v2718_v30 = vld [vmem:[#allocation6 + $0x120] sm:$0xf0]  ;;  %v2724_v31 = vld [vmem:[#allocation6 + $0x108] sm:$0xf] }
  0x6a   : > { %1262 = vmatpush.bf16.msrb.mxu2 %v2945_v32  ;;  %v2997_v32 = vld [vmem:[#allocation6 + $0x124] sm:$0xf0] }
  0x6b   : > { %1275 = vmatpush.bf16.msrb.mxu3 %v2953_v33  ;;  %v2993_v33 = vld [vmem:[#allocation6 + $0x10c] sm:$0xf] }
  0x6d   : > { %1237 = vmatpush.bf16.msrb.mxu0 %v2928_v41  ;;  %1250 = vmatpush.bf16.msrb.mxu1 %v2936_v42 }
  0x6f   : > { %1276 = vmatpush.bf16.msrb.mxu3 %v2952_v45  ;;  %v2988_v45 = vld [vmem:[#allocation6 + $0xdc] sm:$0xf0] }
  0xac   : > { %v426_v44 = vpop.f32.mrf.mxu0 }
  0xad   : > { %v427_v47 = vadd.f32 %v3403_v37, %v426_v44  ;;  %v456_v48 = vpop.f32.mrf.mxu1  ;;  %v2944_v44 = vld [vmem:[#allocation3 + $0x180] sm:$0xff] }
  0xae   : > { %v457_v49 = vadd.f32 %v3403_v37, %v456_v48  ;;  %1263 = vmatpush.bf16.msrb.mxu2 %v2944_v44  ;;  %v2684_v44 = vld [vmem:[#allocation6 + $0xc0] sm:$0xf] }
  0xaf   : > { %v430_v50 = vmax.f32 %v427_v47, 0.0 }
  0xb0   : > { %v460_v54 = vmax.f32 %v457_v49, 0.0 }
  0xb1   : > { %v431_v56 = vpack.c.bf16 %v430_v50, %v430_v50 }
  0xb2   : > { %v461_v57 = vpack.c.bf16 %v460_v54, %v460_v54  ;;  %v2814_v54 = vld [vmem:[#allocation6 + $0x1e0] sm:$0xf0] }
  0xb3   : > { %432 = vst [vmem:[#allocation2] sm:$0x1] %v431_v56  ;;  %v486_v61 = vpop.f32.mrf.mxu2  ;;  %v3021_v56 = vld [vmem:[#allocation6 + $0x1e4] sm:$0xf0]  ;;  %v2817_v63 = vor.u32 %v3016_v53, %v2814_v54  ;;  %v2694_v53 = vld [vmem:[#allocation6 + $0xe8] sm:$0xf0] }
  0xb4   : > { %462 = vst [vmem:[#allocation2 + $0x1] sm:$0x1] %v461_v57  ;;  %v428_v62 = vpop.f32.mrf.mxu0  ;;  %v487_v0 = vadd.f32 %v3403_v37, %v486_v61  ;;  %v3017_v57 = vld [vmem:[#allocation6 + $0x1cc] sm:$0xf]  ;;  %v3008_v61 = vld [vmem:[#allocation6 + $0x184] sm:$0xf] }
  0xb5   : > { %v516_v1 = vpop.f32.mrf.mxu3  ;;  %v458_v2 = vpop.f32.mrf.mxu1  ;;  %v2813_v62 = vor.u32 %v3020_v52, %v2812_v51  ;;  %v2825_v7 = vor.u32 %v3017_v57, %v2822_v58  ;;  %v2985_v52 = vld [vmem:[#allocation6 + $0xcc] sm:$0xf]  ;;  %v2976_v57 = vld [vmem:[#allocation6 + $0x84] sm:$0xf] }
  0xb6   : > { %v517_v3 = vadd.f32 %v3403_v37, %v516_v1  ;;  %v490_v6 = vmax.f32 %v487_v0, 0.0  ;;  %v2782_v0 = vld [vmem:[#allocation6 + $0x1a0] sm:$0xf0]  ;;  %v2788_v1 = vld [vmem:[#allocation6 + $0x188] sm:$0xf]  ;;  %v2697_v54 = vor.u32 %v2985_v52, %v2694_v53 }
  0xb7   : > { %v3013_v2 = vld [vmem:[#allocation6 + $0x1a4] sm:$0xf0]  ;;  %v3006_v52 = vld [vmem:[#allocation6 + $0x16c] sm:$0xf0]  ;;  %v3002_v53 = vld [vmem:[#allocation6 + $0x154] sm:$0xf] }
  0xb8   : > { %v520_v9 = vmax.f32 %v517_v3, 0.0  ;;  %v491_v10 = vpack.c.bf16 %v490_v6, %v490_v6  ;;  %v2821_v6 = vor.u32 %v3021_v56, %v2820_v55  ;;  %v2789_v15 = vor.u32 %v3013_v2, %v2788_v1  ;;  %v2652_v55 = vld [vmem:[#allocation6 + $0x80] sm:$0xf]  ;;  %v2662_v1 = vld [vmem:[#allocation6 + $0xa8] sm:$0xf0] }
  0xb9   : > { %v2980_v56 = vld [vmem:[#allocation6 + $0x9c] sm:$0xf0] }
  0xba   : > { %v521_v11 = vpack.c.bf16 %v520_v9, %v520_v9  ;;  %492 = vst [vmem:[#allocation2 + $0x2] sm:$0x1] %v491_v10  ;;  %v3009_v9 = vld [vmem:[#allocation6 + $0x18c] sm:$0xf]  ;;  %v2653_v58 = vor.u32 %v2980_v56, %v2652_v55  ;;  %v2766_v55 = vld [vmem:[#allocation6 + $0x170] sm:$0xf0] }
  0xbb   : > { %v488_v12 = vpop.f32.mrf.mxu2  ;;  %v2790_v10 = vld [vmem:[#allocation6 + $0x1a8] sm:$0xf0]  ;;  %v2772_v56 = vld [vmem:[#allocation6 + $0x158] sm:$0xf] }
  0xbc   : > { %522 = vst [vmem:[#allocation2 + $0x3] sm:$0x1] %v521_v11  ;;  %v546_v13 = vpop.f32.mrf.mxu0  ;;  %v2781_v11 = vor.u32 %v3012_v60, %v2780_v59  ;;  %v2785_v12 = vor.u32 %v3008_v61, %v2782_v0  ;;  %v2793_v16 = vor.u32 %v3009_v9, %v2790_v10  ;;  %v2654_v59 = vld [vmem:[#allocation6 + $0xa0] sm:$0xf0]  ;;  %v2660_v60 = vld [vmem:[#allocation6 + $0x88] sm:$0xf] }
  0xbd   : > { %v518_v17 = vpop.f32.mrf.mxu3  ;;  %v547_v18 = vadd.f32 %v3403_v37, %v546_v13  ;;  %v576_v19 = vpop.f32.mrf.mxu1  ;;  %v2748_v13 = vld [vmem:[#allocation6 + $0x140] sm:$0xf]  ;;  %v2981_v61 = vld [vmem:[#allocation6 + $0xa4] sm:$0xf0]  ;;  %v2977_v0 = vld [vmem:[#allocation6 + $0x8c] sm:$0xf] }
  0xbe   : > { %v577_v21 = vadd.f32 %v3403_v37, %v576_v19  ;;  %v3000_v17 = vld [vmem:[#allocation6 + $0x144] sm:$0xf]  ;;  %v2756_v19 = vld [vmem:[#allocation6 + $0x148] sm:$0xf]  ;;  %v2749_v23 = vor.u32 %v3004_v14, %v2748_v13  ;;  %v2665_v2 = vor.u32 %v2977_v0, %v2662_v1  ;;  %v2630_v13 = vld [vmem:[#allocation6 + $0x68] sm:$0xf0] }
  0xbf   : > { %v550_v24 = vmax.f32 %v547_v18, 0.0  ;;  %v2750_v18 = vld [vmem:[#allocation6 + $0x160] sm:$0xf0]  ;;  %v2973_v9 = vld [vmem:[#allocation6 + $0x64] sm:$0xf0] }
  0xc0   : > { %v580_v27 = vmax.f32 %v577_v21, 0.0  ;;  %v3001_v21 = vld [vmem:[#allocation6 + $0x14c] sm:$0xf]  ;;  %v2998_v0 = vld [vmem:[#allocation6 + $0x12c] sm:$0xf0] }
  0xc1   : > { %v551_v28 = vpack.c.bf16 %v550_v24, %v550_v24  ;;  %v2753_v24 = vor.u32 %v3000_v17, %v2750_v18  ;;  %v2960_v17 = vld [vmem:[#allocation6 + $0x4] sm:$0xf]  ;;  %v2994_v1 = vld [vmem:[#allocation6 + $0x114] sm:$0xf] }
  0xc2   : > { %v581_v29 = vpack.c.bf16 %v580_v27, %v580_v27  ;;  %v2757_v27 = vor.u32 %v3005_v20, %v2756_v19  ;;  %v2590_v19 = vld [vmem:[#allocation6 + $0x20] sm:$0xf0]  ;;  %v2596_v20 = vld [vmem:[#allocation6 + $0x8] sm:$0xf] }
  0xc3   : > { %552 = vst [vmem:[#allocation2 + $0x4] sm:$0x1] %v551_v28  ;;  %v606_v34 = vpop.f32.mrf.mxu2  ;;  %v2761_v28 = vor.u32 %v3001_v21, %v2758_v22  ;;  %v2965_v21 = vld [vmem:[#allocation6 + $0x24] sm:$0xf0]  ;;  %v2593_v22 = vor.u32 %v2960_v17, %v2590_v19  ;;  %v2708_v19 = vld [vmem:[#allocation6 + $0xd8] sm:$0xf] }
  0xc4   : > { %582 = vst [vmem:[#allocation2 + $0x5] sm:$0x1] %v581_v29  ;;  %v548_v35 = vpop.f32.mrf.mxu0  ;;  %v607_v36 = vadd.f32 %v3403_v37, %v606_v34  ;;  %v2992_v29 = vld [vmem:[#allocation6 + $0x104] sm:$0xf]  ;;  %v2726_v34 = vld [vmem:[#allocation6 + $0x128] sm:$0xf0] }
  0xc5   : > { %v636_v38 = vpop.f32.mrf.mxu3  ;;  %v578_v39 = vpop.f32.mrf.mxu1  ;;  %v2717_v35 = vor.u32 %v2996_v26, %v2716_v25  ;;  %v2598_v25 = vld [vmem:[#allocation6 + $0x28] sm:$0xf0]  ;;  %v2828_v26 = vld [vmem:[#allocation6 + $0x1d0] sm:$0xf] }
  0xc6   : > { %v637_v40 = vadd.f32 %v3403_v37, %v636_v38  ;;  %v610_v43 = vmax.f32 %v607_v36, 0.0  ;;  %v2721_v36 = vor.u32 %v2992_v29, %v2718_v30  ;;  %v2725_v38 = vor.u32 %v2997_v32, %v2724_v31  ;;  %v3018_v29 = vld [vmem:[#allocation6 + $0x1d4] sm:$0xf] }
  0xc7   : > { %v2729_v39 = vor.u32 %v2993_v33, %v2726_v34  ;;  %v2830_v30 = vld [vmem:[#allocation6 + $0x1f0] sm:$0xf0]  ;;  %v2836_v33 = vld [vmem:[#allocation6 + $0x1d8] sm:$0xf] }
  0xc8   : > { %v640_v46 = vmax.f32 %v637_v40, 0.0  ;;  %v611_v47 = vpack.c.bf16 %v610_v43, %v610_v43  ;;  %v2833_v32 = vor.u32 %v3018_v29, %v2830_v30  ;;  %v3023_v34 = vld [vmem:[#allocation6 + $0x1f4] sm:$0xf0]  ;;  %v2670_v29 = vld [vmem:[#allocation6 + $0xb0] sm:$0xf0] }
  0xc9   : > { %v2676_v30 = vld [vmem:[#allocation6 + $0x98] sm:$0xf] }
  0xca   : > { %v641_v48 = vpack.c.bf16 %v640_v46, %v640_v46  ;;  %612 = vst [vmem:[#allocation2 + $0x6] sm:$0x1] %v611_v47  ;;  %v2984_v46 = vld [vmem:[#allocation6 + $0xc4] sm:$0xf]  ;;  %v2685_v47 = vor.u32 %v2988_v45, %v2684_v44  ;;  %v2798_v44 = vld [vmem:[#allocation6 + $0x1b0] sm:$0xf0] }
  0xcb   : > { %v608_v49 = vpop.f32.mrf.mxu2  ;;  %v2804_v45 = vld [vmem:[#allocation6 + $0x198] sm:$0xf] }
  0xcc   : > { %642 = vst [vmem:[#allocation2 + $0x7] sm:$0x1] %v641_v48  ;;  %v2686_v48 = vld [vmem:[#allocation6 + $0xe0] sm:$0xf0]  ;;  %v2692_v49 = vld [vmem:[#allocation6 + $0xc8] sm:$0xf] }
  0xcd   : > { %v638_v37 = vpop.f32.mrf.mxu3 }
  0xce   : > { %v2989_v37 = vld [vmem:[#allocation6 + $0xe4] sm:$0xf0] }
  0xcf   : > { %v2693_v51 = vor.u32 %v2989_v37, %v2692_v49  ;;  %v2806_v49 = vld [vmem:[#allocation6 + $0x1b8] sm:$0xf0] }
  0xd3   : > { %v643_v50 = vld [vmem:[#allocation2] sm:$0xff] }
  0xd4   : > { %777 = vst [vmem:[#allocation1] ss:$9 sm:$0xff] %v643_v50  ;;  %v2689_v50 = vor.u32 %v2984_v46, %v2686_v48  ;;  %v3011_v48 = vld [vmem:[#allocation6 + $0x19c] sm:$0xf] }
  0xdb   : > { %v778_v3 = vld [vmem:[#allocation1] sm:$0xff]  ;;  %v779_v4 = vld [vmem:[#allocation1 + $0x9] sm:$0xff]  ;;  %v780_v5 = vld [vmem:[#allocation1 + $0x12] sm:$0xff] }
  0xdc   : > { %1186 = vmatmul.bf16.vlgmr.msra.gmra.mxu0 %v778_v3  ;;  %1199 = vmatmul.bf16.vlgmr.msra.gmra.mxu1 %v779_v4  ;;  %v781_v8 = vld [vmem:[#allocation1 + $0x1b] sm:$0xff]  ;;  %v782_v40 = vld [vmem:[#allocation1 + $0x24] sm:$0xff]  ;;  %v783_v41 = vld [vmem:[#allocation1 + $0x2d] sm:$0xff] }
  0xdd   : > { %1212 = vmatmul.bf16.vlgmr.msra.gmra.mxu2 %v780_v5  ;;  %1225 = vmatmul.bf16.vlgmr.msra.gmra.mxu3 %v781_v8  ;;  %v784_v42 = vld [vmem:[#allocation1 + $0x36] sm:$0xff]  ;;  %v785_v43 = vld [vmem:[#allocation1 + $0x3f] sm:$0xff]  ;;  %v2620_v3 = vld [vmem:[#allocation6 + $0x40] sm:$0xf] }
  0xde   : > { %1686 = vmatpush.bf16.msra.mxu0 %v2813_v62  ;;  %1699 = vmatpush.bf16.msra.mxu1 %v2817_v63  ;;  %v2657_v62 = vor.u32 %v2976_v57, %v2654_v59  ;;  %v2661_v63 = vor.u32 %v2981_v61, %v2660_v60  ;;  %v2972_v4 = vld [vmem:[#allocation6 + $0x5c] sm:$0xf0]  ;;  %v2968_v5 = vld [vmem:[#allocation6 + $0x44] sm:$0xf]  ;;  %v2628_v8 = vld [vmem:[#allocation6 + $0x48] sm:$0xf] }
  0xdf   : > { %1712 = vmatpush.bf16.msra.mxu2 %v2821_v6  ;;  %1725 = vmatpush.bf16.msra.mxu3 %v2825_v7  ;;  %v2621_v6 = vor.u32 %v2972_v4, %v2620_v3  ;;  %v2622_v7 = vld [vmem:[#allocation6 + $0x60] sm:$0xf0]  ;;  %v3007_v57 = vld [vmem:[#allocation6 + $0x174] sm:$0xf0]  ;;  %v3003_v60 = vld [vmem:[#allocation6 + $0x15c] sm:$0xf] }
  0xe0   : > { %v2625_v10 = vor.u32 %v2968_v5, %v2622_v7  ;;  %v2773_v59 = vor.u32 %v3007_v57, %v2772_v56  ;;  %v2774_v61 = vld [vmem:[#allocation6 + $0x178] sm:$0xf0]  ;;  %v2734_v3 = vld [vmem:[#allocation6 + $0x130] sm:$0xf0]  ;;  %v2740_v4 = vld [vmem:[#allocation6 + $0x118] sm:$0xf] }
  0xe1   : > { %v2999_v5 = vld [vmem:[#allocation6 + $0x134] sm:$0xf0]  ;;  %v2962_v56 = vld [vmem:[#allocation6 + $0x14] sm:$0xf] }
  0xe2   : > { %1687 = vmatpush.bf16.msra.mxu0 %v2781_v11  ;;  %1700 = vmatpush.bf16.msra.mxu1 %v2785_v12  ;;  %v2629_v11 = vor.u32 %v2973_v9, %v2628_v8  ;;  %v2969_v12 = vld [vmem:[#allocation6 + $0x4c] sm:$0xf]  ;;  %v2741_v7 = vor.u32 %v2999_v5, %v2740_v4  ;;  %v2995_v8 = vld [vmem:[#allocation6 + $0x11c] sm:$0xf]  ;;  %v2606_v57 = vld [vmem:[#allocation6 + $0x30] sm:$0xf0] }
  0xe3   : > { %1713 = vmatpush.bf16.msra.mxu2 %v2789_v15  ;;  %1726 = vmatpush.bf16.msra.mxu3 %v2793_v16  ;;  %v2633_v14 = vor.u32 %v2969_v12, %v2630_v13  ;;  %v2588_v15 = vld [vmem:[#allocation6] sm:$0xf]  ;;  %v2742_v9 = vld [vmem:[#allocation6 + $0x138] sm:$0xf0]  ;;  %v2990_v12 = vld [vmem:[#allocation6 + $0xec] sm:$0xf0] }
  0xe4   : > { %v2964_v16 = vld [vmem:[#allocation6 + $0x1c] sm:$0xf0]  ;;  %v2986_v13 = vld [vmem:[#allocation6 + $0xd4] sm:$0xf] }
  0xe5   : > { %v2589_v18 = vor.u32 %v2964_v16, %v2588_v15 }
  0xe6   : > { %1688 = vmatpush.bf16.msra.mxu0 %v2749_v23  ;;  %1701 = vmatpush.bf16.msra.mxu1 %v2753_v24  ;;  %v2597_v23 = vor.u32 %v2965_v21, %v2596_v20  ;;  %v2961_v24 = vld [vmem:[#allocation6 + $0xc] sm:$0xf]  ;;  %v2991_v20 = vld [vmem:[#allocation6 + $0xf4] sm:$0xf0] }
  0xe7   : > { %1714 = vmatpush.bf16.msra.mxu2 %v2757_v27  ;;  %1727 = vmatpush.bf16.msra.mxu3 %v2761_v28  ;;  %v2601_v27 = vor.u32 %v2961_v24, %v2598_v25  ;;  %v3022_v28 = vld [vmem:[#allocation6 + $0x1ec] sm:$0xf0]  ;;  %v2710_v24 = vld [vmem:[#allocation6 + $0xf8] sm:$0xf0] }
  0xe8   : > { %v2829_v31 = vor.u32 %v3022_v28, %v2828_v26  ;;  %v2668_v25 = vld [vmem:[#allocation6 + $0x90] sm:$0xf]  ;;  %v2978_v28 = vld [vmem:[#allocation6 + $0x94] sm:$0xf] }
  0xea   : > { %1689 = vmatpush.bf16.msra.mxu0 %v2717_v35  ;;  %1702 = vmatpush.bf16.msra.mxu1 %v2721_v36  ;;  %v3019_v35 = vld [vmem:[#allocation6 + $0x1dc] sm:$0xf]  ;;  %v2837_v36 = vor.u32 %v3023_v34, %v2836_v33  ;;  %v2673_v34 = vor.u32 %v2978_v28, %v2670_v29  ;;  %v2888_v29 = vld [vmem:[%s3610_s7] sm:$0xff] }
  0xeb   : > { %1715 = vmatpush.bf16.msra.mxu2 %v2725_v38  ;;  %1728 = vmatpush.bf16.msra.mxu3 %v2729_v39  ;;  %v2838_v38 = vld [vmem:[#allocation6 + $0x1f8] sm:$0xf0]  ;;  %v2796_v39 = vld [vmem:[#allocation6 + $0x190] sm:$0xf] }
  0xec   : > { %1238 = vmatmul.bf16.vlgmr.msrb.gmra.mxu0 %v782_v40  ;;  %1251 = vmatmul.bf16.vlgmr.msrb.gmra.mxu1 %v783_v41  ;;  %v3014_v40 = vld [vmem:[#allocation6 + $0x1ac] sm:$0xf0]  ;;  %v2841_v41 = vor.u32 %v3019_v35, %v2838_v38  ;;  %v2678_v35 = vld [vmem:[#allocation6 + $0xb8] sm:$0xf0] }
  0xed   : > { %1264 = vmatmul.bf16.vlgmr.msrb.gmra.mxu2 %v784_v42  ;;  %1277 = vmatmul.bf16.vlgmr.msrb.gmra.mxu3 %v785_v43  ;;  %v2797_v42 = vor.u32 %v3014_v40, %v2796_v39  ;;  %v3010_v43 = vld [vmem:[#allocation6 + $0x194] sm:$0xf]  ;;  %v2974_v39 = vld [vmem:[#allocation6 + $0x6c] sm:$0xf0]  ;;  %v2889_v28 = vld [vmem:[%s3610_s7 + $0x8] sm:$0xff] }
  0xee   : > { %1690 = vmatpush.bf16.msra.mxu0 %v2685_v47  ;;  %1703 = vmatpush.bf16.msra.mxu1 %v2689_v50  ;;  %v2801_v46 = vor.u32 %v3010_v43, %v2798_v44  ;;  %v3015_v47 = vld [vmem:[#allocation6 + $0x1b4] sm:$0xf0]  ;;  %v2809_v50 = vor.u32 %v3011_v48, %v2806_v49  ;;  %v2970_v40 = vld [vmem:[#allocation6 + $0x54] sm:$0xf]  ;;  %v2971_v48 = vld [vmem:[#allocation6 + $0x5c] sm:$0xf] }
  0xef   : > { %1716 = vmatpush.bf16.msra.mxu2 %v2693_v51  ;;  %1729 = vmatpush.bf16.msra.mxu3 %v2697_v54  ;;  %v2805_v37 = vor.u32 %v3015_v47, %v2804_v45  ;;  %v2764_v51 = vld [vmem:[#allocation6 + $0x150] sm:$0xf]  ;;  %v2644_v44 = vld [vmem:[#allocation6 + $0x58] sm:$0xf]  ;;  %v2646_v49 = vld [vmem:[#allocation6 + $0x78] sm:$0xf0] }
  0xf0   : > { %v2765_v54 = vor.u32 %v3006_v52, %v2764_v51  ;;  %v2975_v45 = vld [vmem:[#allocation6 + $0x74] sm:$0xf0] }
  0xf2   : > { %1691 = vmatpush.bf16.msra.mxu0 %v2653_v58  ;;  %1704 = vmatpush.bf16.msra.mxu1 %v2657_v62  ;;  %v2769_v58 = vor.u32 %v3002_v53, %v2766_v55  ;;  %v2777_v62 = vor.u32 %v3003_v60, %v2774_v61  ;;  %v2604_v53 = vld [vmem:[#allocation6 + $0x10] sm:$0xf]  ;;  %v2612_v60 = vld [vmem:[#allocation6 + $0x18] sm:$0xf] }
  0xf3   : > { %1717 = vmatpush.bf16.msra.mxu2 %v2661_v63  ;;  %1730 = vmatpush.bf16.msra.mxu3 %v2665_v2  ;;  %v2732_v63 = vld [vmem:[#allocation6 + $0x110] sm:$0xf]  ;;  %v2967_v61 = vld [vmem:[#allocation6 + $0x34] sm:$0xf0] }
  0xf4   : > { %v2733_v2 = vor.u32 %v2998_v0, %v2732_v63  ;;  %v2966_v55 = vld [vmem:[#allocation6 + $0x2c] sm:$0xf0]  ;;  %v2614_v63 = vld [vmem:[#allocation6 + $0x38] sm:$0xf0] }
  0xf6   : > { %1692 = vmatpush.bf16.msra.mxu0 %v2621_v6  ;;  %1705 = vmatpush.bf16.msra.mxu1 %v2625_v10  ;;  %v2737_v6 = vor.u32 %v2994_v1, %v2734_v3  ;;  %v2745_v10 = vor.u32 %v2995_v8, %v2742_v9  ;;  %v2605_v1 = vor.u32 %v2966_v55, %v2604_v53 }
  0xf7   : > { %1718 = vmatpush.bf16.msra.mxu2 %v2629_v11  ;;  %1731 = vmatpush.bf16.msra.mxu3 %v2633_v14  ;;  %v2700_v11 = vld [vmem:[#allocation6 + $0xd0] sm:$0xf]  ;;  %v2613_v3 = vor.u32 %v2967_v61, %v2612_v60 }
  0xf8   : > { %v3093_v14 = vld [vmem:[%s3607_s4] ss:$0 sm:$0xff]  ;;  %v2701_v17 = vor.u32 %v2990_v12, %v2700_v11 }
  0xfa   : > { %1693 = vmatpush.bf16.msra.mxu0 %v2589_v18  ;;  %1706 = vmatpush.bf16.msra.mxu1 %v2593_v22  ;;  %v2702_v18 = vld [vmem:[#allocation6 + $0xf0] sm:$0xf0]  ;;  %v2709_v22 = vor.u32 %v2991_v20, %v2708_v19  ;;  %v2895_v20 = vld [vmem:[%s3610_s7 + $0x38] sm:$0xff] }
  0xfb   : > { %1719 = vmatpush.bf16.msra.mxu2 %v2597_v23  ;;  %1732 = vmatpush.bf16.msra.mxu3 %v2601_v27  ;;  %v2705_v21 = vor.u32 %v2986_v13, %v2702_v18  ;;  %v2987_v23 = vld [vmem:[#allocation6 + $0xdc] sm:$0xf]  ;;  %v2982_v27 = vld [vmem:[#allocation6 + $0xac] sm:$0xf0] }
  0xfc   : > { %v2713_v26 = vor.u32 %v2987_v23, %v2710_v24  ;;  %v2669_v33 = vor.u32 %v2982_v27, %v2668_v25  ;;  %v2894_v23 = vld [vmem:[%s3610_s7 + $0x30] sm:$0xff]  ;;  %v2893_v24 = vld [vmem:[%s3610_s7 + $0x28] sm:$0xff]  ;;  %v2892_v25 = vld [vmem:[%s3610_s7 + $0x20] sm:$0xff] }
  0xfd   : > { %v2890_v27 = vld [vmem:[%s3610_s7 + $0x10] sm:$0xff] }
  0xfe   : > { %1738 = vmatpush.bf16.msrb.mxu0 %v2829_v31  ;;  %1751 = vmatpush.bf16.msrb.mxu1 %v2833_v32  ;;  %v2983_v31 = vld [vmem:[#allocation6 + $0xb4] sm:$0xf0]  ;;  %v2979_v32 = vld [vmem:[#allocation6 + $0x9c] sm:$0xf] }
  0xff   : > { %1764 = vmatpush.bf16.msrb.mxu2 %v2837_v36  ;;  %1777 = vmatpush.bf16.msrb.mxu3 %v2841_v41  ;;  %v2636_v36 = vld [vmem:[#allocation6 + $0x50] sm:$0xf]  ;;  %v2677_v38 = vor.u32 %v2983_v31, %v2676_v30  ;;  %v2638_v41 = vld [vmem:[#allocation6 + $0x70] sm:$0xf0]  ;;  %v2681_v43 = vor.u32 %v2979_v32, %v2678_v35 }
 0x100   : > { %v2637_v51 = vor.u32 %v2974_v39, %v2636_v36  ;;  %v2641_v52 = vor.u32 %v2970_v40, %v2638_v41  ;;  %v1348_v30 = vld [vmem:[%s3609_s6] sm:$0xff] }
 0x101   : > { %v1350_v31 = vperm.slane %v1348_v30, 0  ;;  %v1351_v32 = vperm.slane %v1348_v30, 1  ;;  %v1352_v40 = vperm.slane %v1348_v30, 2  ;;  %v1353_v41 = vperm.slane %v1348_v30, 3 }
 0x102   : > { %1739 = vmatpush.bf16.msrb.mxu0 %v2797_v42  ;;  %1752 = vmatpush.bf16.msrb.mxu1 %v2801_v46  ;;  %v1354_v53 = vperm.slane %v1348_v30, 4 }
 0x103   : > { %1765 = vmatpush.bf16.msrb.mxu2 %v2805_v37  ;;  %1778 = vmatpush.bf16.msrb.mxu3 %v2809_v50 }
 0x106   : > { %1740 = vmatpush.bf16.msrb.mxu0 %v2765_v54  ;;  %1753 = vmatpush.bf16.msrb.mxu1 %v2769_v58  ;;  %v2645_v54 = vor.u32 %v2975_v45, %v2644_v44 }
 0x107   : > { %1766 = vmatpush.bf16.msrb.mxu2 %v2773_v59  ;;  %1779 = vmatpush.bf16.msrb.mxu3 %v2777_v62  ;;  %v2649_v59 = vor.u32 %v2971_v48, %v2646_v49  ;;  %v2963_v62 = vld [vmem:[#allocation6 + $0x1c] sm:$0xf] }
 0x108   : > { %v2617_v4 = vor.u32 %v2963_v62, %v2614_v63 }
 0x10a   : > { %1741 = vmatpush.bf16.msrb.mxu0 %v2733_v2  ;;  %1754 = vmatpush.bf16.msrb.mxu1 %v2737_v6  ;;  %v2609_v2 = vor.u32 %v2962_v56, %v2606_v57 }
 0x10b   : > { %1767 = vmatpush.bf16.msrb.mxu2 %v2741_v7  ;;  %1780 = vmatpush.bf16.msrb.mxu3 %v2745_v10 }
 0x10e   : > { %1742 = vmatpush.bf16.msrb.mxu0 %v2701_v17  ;;  %1755 = vmatpush.bf16.msrb.mxu1 %v2705_v21 }
 0x10f   : > { %1768 = vmatpush.bf16.msrb.mxu2 %v2709_v22  ;;  %1781 = vmatpush.bf16.msrb.mxu3 %v2713_v26  ;;  %v2891_v26 = vld [vmem:[%s3610_s7 + $0x18] sm:$0xff] }
 0x112   : > { %1743 = vmatpush.bf16.msrb.mxu0 %v2669_v33  ;;  %1756 = vmatpush.bf16.msrb.mxu1 %v2673_v34 }
 0x113   : > { %1769 = vmatpush.bf16.msrb.mxu2 %v2677_v38  ;;  %1782 = vmatpush.bf16.msrb.mxu3 %v2681_v43 }
 0x116   : > { %1744 = vmatpush.bf16.msrb.mxu0 %v2637_v51  ;;  %1757 = vmatpush.bf16.msrb.mxu1 %v2641_v52 }
 0x117   : > { %1770 = vmatpush.bf16.msrb.mxu2 %v2645_v54  ;;  %1783 = vmatpush.bf16.msrb.mxu3 %v2649_v59  ;;  %v1355_v54 = vperm.slane %v1348_v30, 5 }
 0x11a   : > { %1745 = vmatpush.bf16.msrb.mxu0 %v2605_v1  ;;  %1758 = vmatpush.bf16.msrb.mxu1 %v2609_v2  ;;  %v1356_v1 = vperm.slane %v1348_v30, 6  ;;  %v1357_v2 = vperm.slane %v1348_v30, 7 }
 0x11b   : > { %1771 = vmatpush.bf16.msrb.mxu2 %v2613_v3  ;;  %1784 = vmatpush.bf16.msrb.mxu3 %v2617_v4 }
 0x159   : > { %v1187_v15 = vpop.f32.mrf.mxu0  ;;  %v1200_v16 = vpop.f32.mrf.mxu1 }
 0x15a   : > { %v1188_v42 = vadd.f32 %v3093_v14, %v1187_v15 }
 0x15c   : > { %v1201_v58 = vadd.f32 %v1200_v16, %v1188_v42 }
 0x160   : > { %v1213_v46 = vpop.f32.mrf.mxu2  ;;  %v1226_v47 = vpop.f32.mrf.mxu3 }
 0x161   : > { %v1189_v37 = vpop.f32.mrf.mxu0  ;;  %v1202_v50 = vpop.f32.mrf.mxu1  ;;  %v1214_v0 = vadd.f32 %v1213_v46, %v1201_v58 }
 0x163   : > { %v1227_v7 = vadd.f32 %v1226_v47, %v1214_v0 }
 0x168   : > { %v1215_v5 = vpop.f32.mrf.mxu2  ;;  %v1228_v6 = vpop.f32.mrf.mxu3 }
 0x169   : > { %v1239_v8 = vpop.f32.mrf.mxu0  ;;  %v1252_v9 = vpop.f32.mrf.mxu1 }
 0x16a   : > { %v1240_v10 = vadd.f32 %v1239_v8, %v1227_v7 }
 0x16c   : > { %v1253_v11 = vadd.f32 %v1252_v9, %v1240_v10 }
 0x170   : > { %v1265_v12 = vpop.f32.mrf.mxu2  ;;  %v1278_v13 = vpop.f32.mrf.mxu3 }
 0x171   : > { %v1266_v14 = vadd.f32 %v1265_v12, %v1253_v11  ;;  %v1241_v15 = vpop.f32.mrf.mxu0  ;;  %v1254_v16 = vpop.f32.mrf.mxu1 }
 0x173   : > { %v1279_v17 = vadd.f32 %v1278_v13, %v1266_v14 }
 0x175   : > { %v1282_v18 = vmax.f32 %v1279_v17, 0.0 }
 0x177   : > { %v1283_v19 = vpack.c.bf16 %v1282_v18, %v1282_v18 }
 0x178   : > { %v1267_v21 = vpop.f32.mrf.mxu2  ;;  %v1280_v22 = vpop.f32.mrf.mxu3 }
 0x179   : > { %1694 = vmatmul.bf16.vlgmr.msra.gmra.mxu0 %v1283_v19  ;;  %1707 = vmatmul.bf16.vlgmr.msra.gmra.mxu1 %v1283_v19  ;;  %v3233_v22 = vmov 286326784  }
 0x17a   : > { %1720 = vmatmul.bf16.vlgmr.msra.gmra.mxu2 %v1283_v19  ;;  %1733 = vmatmul.bf16.vlgmr.msra.gmra.mxu3 %v1283_v19 }
 0x17b   : > { %1850 = vmatpush.bf16.msra.mxu0 %v2895_v20  ;;  %1898 = vmatpush.bf16.msra.mxu1 %v2895_v20 }
 0x17c   : > { %1940 = vmatpush.bf16.msra.mxu2 %v2895_v20  ;;  %1987 = vmatpush.bf16.msra.mxu3 %v2895_v20 }
 0x17f   : > { %1851 = vmatpush.bf16.msra.mxu0 %v2894_v23  ;;  %1899 = vmatpush.bf16.msra.mxu1 %v2894_v23 }
 0x180   : > { %1941 = vmatpush.bf16.msra.mxu2 %v2894_v23  ;;  %1988 = vmatpush.bf16.msra.mxu3 %v2894_v23 }
 0x183   : > { %1852 = vmatpush.bf16.msra.mxu0 %v2893_v24  ;;  %1900 = vmatpush.bf16.msra.mxu1 %v2893_v24 }
 0x184   : > { %1942 = vmatpush.bf16.msra.mxu2 %v2893_v24  ;;  %1989 = vmatpush.bf16.msra.mxu3 %v2893_v24 }
 0x187   : > { %1853 = vmatpush.bf16.msra.mxu0 %v2892_v25  ;;  %1901 = vmatpush.bf16.msra.mxu1 %v2892_v25 }
 0x188   : > { %1943 = vmatpush.bf16.msra.mxu2 %v2892_v25  ;;  %1990 = vmatpush.bf16.msra.mxu3 %v2892_v25 }
 0x189   : > { %1746 = vmatmul.bf16.vlgmr.msrb.gmra.mxu0 %v1283_v19  ;;  %1759 = vmatmul.bf16.vlgmr.msrb.gmra.mxu1 %v1283_v19 }
 0x18a   : > { %1772 = vmatmul.bf16.vlgmr.msrb.gmra.mxu2 %v1283_v19  ;;  %1785 = vmatmul.bf16.vlgmr.msrb.gmra.mxu3 %v1283_v19  ;;  %v3446_v19 = vld [vmem:[%s3611_s8] ss:$0 sm:$0xff] }
 0x18b   : > { %1854 = vmatpush.bf16.msra.mxu0 %v2891_v26  ;;  %1902 = vmatpush.bf16.msra.mxu1 %v2891_v26 }
 0x18c   : > { %1944 = vmatpush.bf16.msra.mxu2 %v2891_v26  ;;  %1991 = vmatpush.bf16.msra.mxu3 %v2891_v26 }
 0x18f   : > { %1855 = vmatpush.bf16.msra.mxu0 %v2890_v27  ;;  %1903 = vmatpush.bf16.msra.mxu1 %v2890_v27 }
 0x190   : > { %1945 = vmatpush.bf16.msra.mxu2 %v2890_v27  ;;  %1992 = vmatpush.bf16.msra.mxu3 %v2890_v27 }
 0x193   : > { %1856 = vmatpush.bf16.msra.mxu0 %v2889_v28  ;;  %1904 = vmatpush.bf16.msra.mxu1 %v2889_v28 }
 0x194   : > { %1946 = vmatpush.bf16.msra.mxu2 %v2889_v28  ;;  %1993 = vmatpush.bf16.msra.mxu3 %v2889_v28 }
 0x197   : > { %1857 = vmatpush.bf16.msra.mxu0 %v2888_v29  ;;  %1905 = vmatpush.bf16.msra.mxu1 %v2888_v29 }
 0x198   : > { %1947 = vmatpush.bf16.msra.mxu2 %v2888_v29  ;;  %1994 = vmatpush.bf16.msra.mxu3 %v2888_v29 }
 0x19b   : > { %2029 = vmatpush.bf16.msrb.mxu0 %v2895_v20  ;;  %2076 = vmatpush.bf16.msrb.mxu1 %v2895_v20 }
 0x19c   : > { %2118 = vmatpush.bf16.msrb.mxu2 %v2895_v20  ;;  %2165 = vmatpush.bf16.msrb.mxu3 %v2895_v20 }
 0x19f   : > { %2030 = vmatpush.bf16.msrb.mxu0 %v2894_v23  ;;  %2077 = vmatpush.bf16.msrb.mxu1 %v2894_v23 }
 0x1a0   : > { %2119 = vmatpush.bf16.msrb.mxu2 %v2894_v23  ;;  %2166 = vmatpush.bf16.msrb.mxu3 %v2894_v23  ;;  %v1876_v23 = vunpack.c.l.s4 %v3233_v22 }
 0x1a3   : > { %2031 = vmatpush.bf16.msrb.mxu0 %v2893_v24  ;;  %2078 = vmatpush.bf16.msrb.mxu1 %v2893_v24 }
 0x1a4   : > { %2120 = vmatpush.bf16.msrb.mxu2 %v2893_v24  ;;  %2167 = vmatpush.bf16.msrb.mxu3 %v2893_v24 }
 0x1a7   : > { %2032 = vmatpush.bf16.msrb.mxu0 %v2892_v25  ;;  %2079 = vmatpush.bf16.msrb.mxu1 %v2892_v25 }
 0x1a8   : > { %2121 = vmatpush.bf16.msrb.mxu2 %v2892_v25  ;;  %2168 = vmatpush.bf16.msrb.mxu3 %v2892_v25 }
 0x1ab   : > { %2033 = vmatpush.bf16.msrb.mxu0 %v2891_v26  ;;  %2080 = vmatpush.bf16.msrb.mxu1 %v2891_v26 }
 0x1ac   : > { %2122 = vmatpush.bf16.msrb.mxu2 %v2891_v26  ;;  %2169 = vmatpush.bf16.msrb.mxu3 %v2891_v26 }
 0x1af   : > { %2034 = vmatpush.bf16.msrb.mxu0 %v2890_v27  ;;  %2081 = vmatpush.bf16.msrb.mxu1 %v2890_v27 }
 0x1b0   : > { %2123 = vmatpush.bf16.msrb.mxu2 %v2890_v27  ;;  %2170 = vmatpush.bf16.msrb.mxu3 %v2890_v27 }
 0x1b3   : > { %2035 = vmatpush.bf16.msrb.mxu0 %v2889_v28  ;;  %2082 = vmatpush.bf16.msrb.mxu1 %v2889_v28 }
 0x1b4   : > { %2124 = vmatpush.bf16.msrb.mxu2 %v2889_v28  ;;  %2171 = vmatpush.bf16.msrb.mxu3 %v2889_v28  ;;  %v3453_v28 = vunpack.c.0.s8 %v1876_v23  ;;  %v2066_v23 = vld [vmem:[%s3457_s29] sm:$0x4] }
 0x1b7   : > { %2036 = vmatpush.bf16.msrb.mxu0 %v2888_v29  ;;  %2083 = vmatpush.bf16.msrb.mxu1 %v2888_v29 }
 0x1b8   : > { %2125 = vmatpush.bf16.msrb.mxu2 %v2888_v29  ;;  %2172 = vmatpush.bf16.msrb.mxu3 %v2888_v29 }
 0x1f6   : > { %v1695_v33 = vpop.f32.mrf.mxu0  ;;  %v1708_v34 = vpop.f32.mrf.mxu1 }
 0x1f7   : > { %v1696_v35 = vadd.f32 %v1695_v33, %v1350_v31  ;;  %v1709_v36 = vadd.f32 %v1708_v34, %v1351_v32  ;;  %v1888_v34 = vld [vmem:[%s3457_s29] sm:$0x1] }
 0x1f9   : > { %v1790_v38 = vmax.f32 %v1696_v35, 0.0  ;;  %v1791_v39 = vmax.f32 %v1709_v36, 0.0 }
 0x1fb   : > { %v1798_v42 = vpack.c.bf16 %v1791_v39, %v1790_v38  ;;  %v1891_v39 = vld [vmem:[%s3457_s29 + $0x4] sm:$0x1] }
 0x1fd   : > { %v1895_v43 = vunpack.c.h.b16 %v1798_v42  ;;  %v1721_v44 = vpop.f32.mrf.mxu2  ;;  %v1734_v45 = vpop.f32.mrf.mxu3  ;;  %1858 = vmatmul.bf16.vlgmr.msra.gmra.mxu0 %v1798_v42 }
 0x1fe   : > { %v1722_v46 = vadd.f32 %v1721_v44, %v1352_v40  ;;  %v1735_v47 = vadd.f32 %v1734_v45, %v1353_v41  ;;  %v1697_v48 = vpop.f32.mrf.mxu0  ;;  %v1710_v49 = vpop.f32.mrf.mxu1 }
 0x1ff   : > { %v1896_v37 = vpack.c.b16 %v1895_v43, %v1895_v43 }
 0x200   : > { %v1792_v50 = vmax.f32 %v1722_v46, 0.0  ;;  %v1793_v51 = vmax.f32 %v1735_v47, 0.0 }
 0x201   : > { %1906 = vmatmul.bf16.vlgmr.msra.gmra.mxu1 %v1896_v37 }
 0x202   : > { %v1799_v52 = vpack.c.bf16 %v1793_v51, %v1792_v50 }
 0x204   : > { %v1984_v55 = vunpack.c.h.b16 %v1799_v52  ;;  %1948 = vmatmul.bf16.vlgmr.msra.gmra.mxu2 %v1799_v52 }
 0x205   : > { %v1723_v56 = vpop.f32.mrf.mxu2  ;;  %v1736_v57 = vpop.f32.mrf.mxu3 }
 0x206   : > { %v1985_v58 = vpack.c.b16 %v1984_v55, %v1984_v55  ;;  %v1747_v59 = vpop.f32.mrf.mxu0  ;;  %v1760_v60 = vpop.f32.mrf.mxu1 }
 0x207   : > { %v1748_v61 = vadd.f32 %v1747_v59, %v1354_v53  ;;  %v1761_v62 = vadd.f32 %v1760_v60, %v1355_v54 }
 0x208   : > { %1995 = vmatmul.bf16.vlgmr.msra.gmra.mxu3 %v1985_v58 }
 0x209   : > { %v1794_v63 = vmax.f32 %v1748_v61, 0.0  ;;  %v1795_v0 = vmax.f32 %v1761_v62, 0.0 }
 0x20b   : > { %v1800_v3 = vpack.c.bf16 %v1795_v0, %v1794_v63 }
 0x20d   : > { %v2073_v4 = vunpack.c.h.b16 %v1800_v3  ;;  %v1773_v5 = vpop.f32.mrf.mxu2  ;;  %v1786_v6 = vpop.f32.mrf.mxu3  ;;  %2037 = vmatmul.bf16.vlgmr.msrb.gmra.mxu0 %v1800_v3 }
 0x20e   : > { %v1774_v7 = vadd.f32 %v1773_v5, %v1356_v1  ;;  %v1787_v8 = vadd.f32 %v1786_v6, %v1357_v2  ;;  %v1749_v9 = vpop.f32.mrf.mxu0  ;;  %v1762_v10 = vpop.f32.mrf.mxu1  ;;  %v1977_v2 = vld [vmem:[%s3457_s29] sm:$0x2]  ;;  %v2158_v6 = vld [vmem:[%s3457_s29 + $0x4] sm:$0x8] }
 0x20f   : > { %v2074_v11 = vpack.c.b16 %v2073_v4, %v2073_v4 }
 0x210   : > { %v1796_v12 = vmax.f32 %v1774_v7, 0.0  ;;  %v1797_v13 = vmax.f32 %v1787_v8, 0.0 }
 0x211   : > { %2084 = vmatmul.bf16.vlgmr.msrb.gmra.mxu1 %v2074_v11 }
 0x212   : > { %v1801_v14 = vpack.c.bf16 %v1797_v13, %v1796_v12  ;;  %v1980_v13 = vld [vmem:[%s3457_s29 + $0x4] sm:$0x2] }
 0x214   : > { %v2162_v15 = vunpack.c.h.b16 %v1801_v14  ;;  %2126 = vmatmul.bf16.vlgmr.msrb.gmra.mxu2 %v1801_v14 }
 0x215   : > { %v1775_v16 = vpop.f32.mrf.mxu2  ;;  %v1788_v17 = vpop.f32.mrf.mxu3 }
 0x216   : > { %v2163_v18 = vpack.c.b16 %v2162_v15, %v2162_v15 }
 0x218   : > { %2173 = vmatmul.bf16.vlgmr.msrb.gmra.mxu3 %v2163_v18 }
 0x27a   : > { %v1859_v20 = vpop.f32.mrf.mxu0 }
 0x27b   : > { %v1860_v21 = vadd.f32 %v3446_v19, %v1859_v20 }
 0x27d   : > { %v1863_v24 = vpack.c.bf16 %v1860_v21, %v1860_v21 }
 0x27e   : > { %v1907_v25 = vpop.f32.mrf.mxu1 }
 0x27f   : > { %v1865_v26 = vrot.slane %v1863_v24, 3  ;;  %v1908_v27 = vadd.f32 %v3446_v19, %v1907_v25 }
 0x281   : > { %v1869_v29 = vsel %vm1866_vm2, %v1863_v24, %v1865_v26  ;;  %v1911_v30 = vpack.c.bf16 %v1908_v27, %v1908_v27 }
 0x282   : > { %v1872_v31 = vunpack.i.h.s16 %v1869_v29  ;;  %v2874_v32 = vpack.i.b16 %v1869_v29, %v1869_v29  ;;  %v1861_v33 = vpop.f32.mrf.mxu0 }
 0x283   : > { %v1913_v35 = vrot.slane %v1911_v30, 3 }
 0x284   : > { %v1874_v36 = vpack.i.b16 %v1872_v31, %v1872_v31  ;;  %v1878_v38 = vperm.slane %v2874_v32, %v3453_v28  ;;  %v2069_v31 = vld [vmem:[%s3457_s29 + $0x4] sm:$0x4] }
 0x285   : > { %v1916_v40 = vsel %vm1866_vm2, %v1911_v30, %v1913_v35 }
 0x286   : > { %v1882_v41 = vperm.slane %v1874_v36, %v3453_v28  ;;  %v1889_v42 = vsel %vm1887_vm5, %v1878_v38, %v1888_v34  ;;  %v1919_v43 = vunpack.i.h.s16 %v1916_v40  ;;  %v1909_v44 = vpop.f32.mrf.mxu1  ;;  %v2875_v48 = vpack.i.b16 %v1916_v40, %v1916_v40 }
 0x287   : > { %1890 = vst [vmem:[%s3457_s29] sm:$0x1] %v1889_v42  ;;  %v1949_v45 = vpop.f32.mrf.mxu2 }
 0x288   : > { %v1892_v46 = vsel %vm1887_vm5, %v1882_v41, %v1891_v39  ;;  %v1950_v47 = vadd.f32 %v3446_v19, %v1949_v45  ;;  %v1921_v49 = vpack.i.b16 %v1919_v43, %v1919_v43  ;;  %v1925_v56 = vperm.slane %v2875_v48, %v3453_v28  ;;  %vm2154_vm5 = vmand %vm2152_vm3, %vm2153_vm4 }
 0x289   : > { %1893 = vst [vmem:[%s3457_s29 + $0x4] sm:$0x1] %v1892_v46 }
 0x28a   : > { %v1953_v37 = vpack.c.bf16 %v1950_v47, %v1950_v47  ;;  %v2038_v50 = vpop.f32.mrf.mxu0  ;;  %v1929_v58 = vperm.slane %v1921_v49, %v3453_v28 }
 0x28b   : > { %v1996_v51 = vpop.f32.mrf.mxu3  ;;  %v2039_v52 = vadd.f32 %v3446_v19, %v2038_v50 }
 0x28c   : > { %v1955_v54 = vrot.slane %v1953_v37, 3  ;;  %v1997_v55 = vadd.f32 %v3446_v19, %v1996_v51 }
 0x28d   : > { %v2042_v57 = vpack.c.bf16 %v2039_v52, %v2039_v52 }
 0x28e   : > { %v1934_v59 = vld [vmem:[%s3457_s29] sm:$0x1]  ;;  %v1958_v60 = vsel %vm1866_vm2, %v1953_v37, %v1955_v54  ;;  %v2000_v61 = vpack.c.bf16 %v1997_v55, %v1997_v55  ;;  %v2085_v62 = vpop.f32.mrf.mxu1 }
 0x28f   : > { %v1935_v63 = vsel %vm3469_vm7, %v1925_v56, %v1934_v59  ;;  %v1961_v0 = vunpack.i.h.s16 %v1958_v60  ;;  %v2876_v1 = vpack.i.b16 %v1958_v60, %v1958_v60  ;;  %v2044_v3 = vrot.slane %v2042_v57, 3  ;;  %v1951_v4 = vpop.f32.mrf.mxu2 }
 0x290   : > { %1936 = vst [vmem:[%s3457_s29] sm:$0x1] %v1935_v63  ;;  %v1937_v5 = vld [vmem:[%s3457_s29 + $0x4] sm:$0x1]  ;;  %v2002_v7 = vrot.slane %v2000_v61, 3  ;;  %v2086_v8 = vadd.f32 %v3446_v19, %v2085_v62 }
 0x291   : > { %v1938_v9 = vsel %vm3469_vm7, %v1929_v58, %v1937_v5  ;;  %v1963_v10 = vpack.i.b16 %v1961_v0, %v1961_v0  ;;  %v1967_v11 = vperm.slane %v2876_v1, %v3453_v28  ;;  %v2047_v12 = vsel %vm1866_vm2, %v2042_v57, %v2044_v3  ;;  %v2155_v1 = vld [vmem:[%s3457_s29] sm:$0x8] }
 0x292   : > { %1939 = vst [vmem:[%s3457_s29 + $0x4] sm:$0x1] %v1938_v9  ;;  %v2005_v14 = vsel %vm1866_vm2, %v2000_v61, %v2002_v7  ;;  %v2050_v15 = vunpack.i.h.s16 %v2047_v12  ;;  %v2878_v16 = vpack.i.b16 %v2047_v12, %v2047_v12  ;;  %v2089_v17 = vpack.c.bf16 %v2086_v8, %v2086_v8  ;;  %v2040_v18 = vpop.f32.mrf.mxu0 }
 0x293   : > { %v1971_v20 = vperm.slane %v1963_v10, %v3453_v28  ;;  %v1978_v21 = vsel %vm3485_vm11, %v1967_v11, %v1977_v2  ;;  %v1998_v24 = vpop.f32.mrf.mxu3  ;;  %v2008_v25 = vunpack.i.h.s16 %v2005_v14  ;;  %v2877_v32 = vpack.i.b16 %v2005_v14, %v2005_v14 }
 0x294   : > { %1979 = vst [vmem:[%s3457_s29] sm:$0x2] %v1978_v21  ;;  %v2052_v26 = vpack.i.b16 %v2050_v15, %v2050_v15  ;;  %v2056_v27 = vperm.slane %v2878_v16, %v3453_v28  ;;  %v2091_v29 = vrot.slane %v2089_v17, 3 }
 0x295   : > { %v1981_v30 = vsel %vm3485_vm11, %v1971_v20, %v1980_v13  ;;  %v2010_v40 = vpack.i.b16 %v2008_v25, %v2008_v25  ;;  %v2014_v45 = vperm.slane %v2877_v32, %v3453_v28 }
 0x296   : > { %1982 = vst [vmem:[%s3457_s29 + $0x4] sm:$0x2] %v1981_v30  ;;  %v2060_v33 = vperm.slane %v2052_v26, %v3453_v28  ;;  %v2067_v34 = vsel %vm3502_vm13, %v2056_v27, %v2066_v23  ;;  %v2094_v35 = vsel %vm1866_vm2, %v2089_v17, %v2091_v29  ;;  %v2087_v36 = vpop.f32.mrf.mxu1 }
 0x297   : > { %2068 = vst [vmem:[%s3457_s29] sm:$0x4] %v2067_v34  ;;  %v2097_v38 = vunpack.i.h.s16 %v2094_v35  ;;  %v2127_v39 = vpop.f32.mrf.mxu2  ;;  %v2879_v44 = vpack.i.b16 %v2094_v35, %v2094_v35  ;;  %v2018_v37 = vperm.slane %v2010_v40, %v3453_v28 }
 0x298   : > { %v2070_v41 = vsel %vm3502_vm13, %v2060_v33, %v2069_v31  ;;  %v2128_v42 = vadd.f32 %v3446_v19, %v2127_v39 }
 0x299   : > { %2071 = vst [vmem:[%s3457_s29 + $0x4] sm:$0x4] %v2070_v41  ;;  %v2099_v48 = vpack.i.b16 %v2097_v38, %v2097_v38  ;;  %v2103_v55 = vperm.slane %v2879_v44, %v3453_v28 }
 0x29a   : > { %v2131_v46 = vpack.c.bf16 %v2128_v42, %v2128_v42 }
 0x29b   : > { %v2023_v47 = vld [vmem:[%s3457_s29] sm:$0x2]  ;;  %v2174_v49 = vpop.f32.mrf.mxu3 }
 0x29c   : > { %v2024_v50 = vsel %vm3522_vm15, %v2014_v45, %v2023_v47  ;;  %v2133_v52 = vrot.slane %v2131_v46, 3  ;;  %v2175_v53 = vadd.f32 %v3446_v19, %v2174_v49  ;;  %v2107_v19 = vperm.slane %v2099_v48, %v3453_v28 }
 0x29d   : > { %2025 = vst [vmem:[%s3457_s29] sm:$0x2] %v2024_v50  ;;  %v2026_v54 = vld [vmem:[%s3457_s29 + $0x4] sm:$0x2] }
 0x29e   : > { %v2027_v56 = vsel %vm3522_vm15, %v2018_v37, %v2026_v54  ;;  %v2112_v57 = vld [vmem:[%s3457_s29] sm:$0x4]  ;;  %v2136_v58 = vsel %vm1866_vm2, %v2131_v46, %v2133_v52  ;;  %v2178_v59 = vpack.c.bf16 %v2175_v53, %v2175_v53 }
 0x29f   : > { %2028 = vst [vmem:[%s3457_s29 + $0x4] sm:$0x2] %v2027_v56  ;;  %v2113_v60 = vsel %vm3533_vm1, %v2103_v55, %v2112_v57  ;;  %v2139_v61 = vunpack.i.h.s16 %v2136_v58  ;;  %v2880_v62 = vpack.i.b16 %v2136_v58, %v2136_v58  ;;  %v2129_v63 = vpop.f32.mrf.mxu2 }
 0x2a0   : > { %2114 = vst [vmem:[%s3457_s29] sm:$0x4] %v2113_v60  ;;  %v2115_v0 = vld [vmem:[%s3457_s29 + $0x4] sm:$0x4]  ;;  %v2180_v2 = vrot.slane %v2178_v59, 3 }
 0x2a1   : > { %v2116_v3 = vsel %vm3533_vm1, %v2107_v19, %v2115_v0  ;;  %v2141_v4 = vpack.i.b16 %v2139_v61, %v2139_v61  ;;  %v2145_v5 = vperm.slane %v2880_v62, %v3453_v28 }
 0x2a2   : > { %2117 = vst [vmem:[%s3457_s29 + $0x4] sm:$0x4] %v2116_v3  ;;  %v2183_v7 = vsel %vm1866_vm2, %v2178_v59, %v2180_v2  ;;  %vm2200_vm2 = vmand %vm2152_vm3, %vm2199_vm6 }
 0x2a3   : > { %v2149_v8 = vperm.slane %v2141_v4, %v3453_v28  ;;  %v2156_v9 = vsel %vm2154_vm5, %v2145_v5, %v2155_v1  ;;  %v2176_v10 = vpop.f32.mrf.mxu3  ;;  %v2186_v11 = vunpack.i.h.s16 %v2183_v7  ;;  %v2881_v13 = vpack.i.b16 %v2183_v7, %v2183_v7 }
 0x2a4   : > { %2157 = vst [vmem:[%s3457_s29] sm:$0x8] %v2156_v9 }
 0x2a5   : > { %v2159_v12 = vsel %vm2154_vm5, %v2149_v8, %v2158_v6  ;;  %v2188_v14 = vpack.i.b16 %v2186_v11, %v2186_v11  ;;  %v2192_v15 = vperm.slane %v2881_v13, %v3453_v28 }
 0x2a6   : > { %2160 = vst [vmem:[%s3457_s29 + $0x4] sm:$0x8] %v2159_v12 }
 0x2a7   : > { %v2196_v17 = vperm.slane %v2188_v14, %v3453_v28 }
 0x2ab   : > { %v2201_v16 = vld [vmem:[%s3457_s29] sm:$0x8] }
 0x2ac   : > { %v2202_v18 = vsel %vm2200_vm2, %v2192_v15, %v2201_v16 }
 0x2ad   : > { %2203 = vst [vmem:[%s3457_s29] sm:$0x8] %v2202_v18  ;;  %v2204_v20 = vld [vmem:[%s3457_s29 + $0x4] sm:$0x8] }
 0x2ae   : > { %v2205_v21 = vsel %vm2200_vm2, %v2196_v17, %v2204_v20 }
 0x2af   : > { %2206 = vst [vmem:[%s3457_s29 + $0x4] sm:$0x8] %v2205_v21 }
 0x2b0   : > { %3182 = shalt.err (!%p3179_p8)
}
 0x2b1   : > { %s3234_s27 = smov 64   ;;  %s3235_s29 = smov 4  }
 0x2b2   : > { %3033 = dma.vmem_to_hbm [thread:$0]  (%p3324_p5), %s2221_s23, 128, %s2223_s24, %s2208_s13, %s3234_s27, %s3234_s27, %s3235_s29  }
 0x2b3 PF: > { %p3050_p9 = scmp.ge.s32.totalorder %s3225_s12, 2  ;;  %s2237_s17 = sand.u32 1, %s3213_s30  }
 0x2b4   : > { %s2238_s22 = scalar_lea.sflag [#allocation5], %s2237_s17 }
 0x2b5   : > { %p3043_p10 = pnand %p3050_p9, %p3328_p6 }
 0x2b7   : > { %p3044_p11 = pneg %p3043_p10 }
 0x2b9   : > { %3208 = dma.done.wait (%p3044_p11), %s2238_s22, 128  }
 0x2ba   : > { %3210 = vsyncadd (%p3044_p11), %s2238_s22, 4294967168  ;;  %p21_p12 = scmp.ge.s32.totalorder %s3311_s15, 4   ;;  %s3628_s30 = smov %s3217_s10 }
 0x2bb   : > { %s3629_s10 = smov %s3221_s11  ;;  %s3630_s11 = smov %s3322_s18 }
 0x2bc   : > { %s3631_s12 = smov %s3311_s15  ;;  %23 = sbr.rel (!%p21_p12) target bundleno = 7 (0x7), region = 100 }
 0x2c1   :  { %2244 = vsyncpa [#allocation4], 1 }
 0x2c2   :  { %2246 = vsyncpa [#allocation4 + $0x1], 1 }
 0x2c3   :  { %2247 = vsyncpa [#allocation7], 1 }
 0x2c4   :  { %2248 = vsyncpa [#allocation5], 1 }
 0x2c5   :  { %2250 = vsyncpa [#allocation5 + $0x1], 1 }

</bundles_post_ra>
